<compile_context>
chip_gen: v7x
topology: tpu7x:2x2x1
jax: 0.10.0
libtpu: 0.0.40
codegen_flags: <defaults>
</compile_context>

<pallas_src>
import functools
import math

import numpy as np
import jax
import jax.numpy as jnp
from jax import lax
from jax.experimental import pallas as pl
from jax.experimental.pallas import tpu as pltpu

LN_EPS = 1e-12
INV_SQRT2 = 1.0 / math.sqrt(2.0)
TANH_GELU_C = math.sqrt(2.0 / math.pi)


def _round_up(x, m):
    return (x + m - 1) // m * m


def _layernorm(x, g, b):
    # Matches FMLP-Rec LayerNorm: mean/var over last dim, eps inside the sqrt.
    mu = jnp.mean(x, axis=-1, keepdims=True)
    var = jnp.mean((x - mu) ** 2, axis=-1, keepdims=True)
    return g * ((x - mu) * lax.rsqrt(var + LN_EPS)) + b


def _erf(x):
    # erf built only from exp/abs/where (guaranteed Mosaic lowering), ~1e-7 abs err.
    # TODO(synk): switch to jax.lax.erf if/when its Mosaic lowering is guaranteed;
    # the exp already runs on the EUP, the Horner chain is VPU filler.
    a = jnp.abs(x)
    t = 1.0 / (1.0 + 0.5 * a)
    y = t * jnp.exp(
        -a * a - 1.26551223 + t * (1.00002368 + t * (0.37409196 + t * (0.09678418
        + t * (-0.18628806 + t * (0.27886807 + t * (-1.13520398 + t * (1.48851587
        + t * (-0.82215223 + t * 0.17087277)))))))))
    return jnp.where(x >= 0, 1.0 - y, y - 1.0)


# ----------------------------- fused encoder kernel -----------------------------
def fused_encoder_kernel(x_ref, cr_ref, ci_ref, ar_ref, ai_ref,
                         wr_ref, wi_ref,
                         g1_ref, b1_ref, w1_ref, bb1_ref, w2_ref, bb2_ref,
                         g2_ref, b2_ref, o_ref, h_ref,
                         *, mlp_dtype, store_every_layer, approx_gelu):
    # grid = (batch_tiles [parallel], layers [arbitrary, innermost])
    layer = pl.program_id(1)

    # At layer 0 of each batch tile: load the (TB, S, H) input into the VMEM-
    # resident running activation.
    @pl.when(layer == 0)
    def _():
        h_ref[...] = x_ref[...].astype(jnp.float32)

    h = h_ref[...]                                             # (TB, S, H) fp32
    TB, S, H = h.shape

    # ------------------------------ FilterLayer ------------------------------
    # Per-sequence rfft/irfft as batched MXU matmuls ('bks,bsh->bkh'); operators
    # are small constants resident in VMEM.  fp32 operands keep the filter exact.
    dn = (((2,), (1,)), ((0,), (0,)))
    xr = lax.dot_general(cr_ref[...], h, dn, preferred_element_type=jnp.float32)
    xi = lax.dot_general(ci_ref[...], h, dn, preferred_element_type=jnp.float32)
    wr = wr_ref[0][None]                                       # (1, Kp, H) bcast TB
    wi = wi_ref[0][None]
    yr = xr * wr - xi * wi
    yi = xr * wi + xi * wr
    # irfft: two batched dots accumulated in fp32 (no concat / stacked slab).
    y = lax.dot_general(ar_ref[...], yr, dn, preferred_element_type=jnp.float32)
    y = y + lax.dot_general(ai_ref[...], yi, dn, preferred_element_type=jnp.float32)
    h1 = _layernorm(y + h, g1_ref[0], b1_ref[0])               # dropout = identity

    # ---------------------------- Intermediate MLP ----------------------------
    # Flat (TB*S, H) view => M = TB*S per dense matmul (better MXU fill).  The
    # reshape is a free leading-dim merge when S % 8 == 0.
    h1_2d = h1.reshape(TB * S, H)
    t = jnp.dot(h1_2d.astype(mlp_dtype), w1_ref[0],
                preferred_element_type=jnp.float32) + bb1_ref[0]
    if approx_gelu:
        # tanh-approx GELU: keeps the big (TB*S, I) transcendental on the EUP.
        t = 0.5 * t * (1.0 + jnp.tanh(TANH_GELU_C * (t + 0.044715 * t * t * t)))
    else:
        t = 0.5 * t * (1.0 + _erf(t * INV_SQRT2))              # exact GELU
    u = jnp.dot(t.astype(mlp_dtype), w2_ref[0],
                preferred_element_type=jnp.float32) + bb2_ref[0]
    h2 = _layernorm(u.reshape(TB, S, H) + h1, g2_ref[0], b2_ref[0])

    h_ref[...] = h2                                            # carry to next layer

    out = h2.astype(o_ref.dtype)
    if store_every_layer:
        o_ref[0] = out                                         # every layer's output
    else:
        @pl.when(layer == pl.num_programs(1) - 1)
        def _():
            o_ref[...] = out                                   # last layer only


# ------------------------- DFT operators & wrapper glue --------------------------
def _dft_matrices(S, Kp):
    """norm='ortho' rfft/irfft as real matrices, zero-padded to Kp frequencies."""
    K = S // 2 + 1
    n = jnp.arange(S, dtype=jnp.float32)
    k = jnp.arange(K, dtype=jnp.float32)
    ang = 2.0 * math.pi * jnp.outer(k, n) / S                  # (K, S)
    scale = 1.0 / math.sqrt(S)
    crT = jnp.cos(ang) * scale                                 # rfft real part
    ciT = -jnp.sin(ang) * scale                                # rfft imag part
    kk = jnp.arange(K)
    is_dc = (kk == 0)
    is_nyq = (kk == (S // 2)) if S % 2 == 0 else jnp.zeros_like(kk, dtype=bool)
    c = jnp.where(is_dc | is_nyq, 1.0, 2.0)                    # Hermitian doubling
    ar = (crT * c[:, None]).T                                  # (S, K) irfft vs real
    ai = (ciT * c[:, None]).T                                  # (S, K) irfft vs imag
    pad_r = ((0, Kp - K), (0, 0))
    pad_c = ((0, 0), (0, Kp - K))
    return (jnp.pad(crT, pad_r), jnp.pad(ciT, pad_r),
            jnp.pad(ar, pad_c), jnp.pad(ai, pad_c))


def _vmem_limit_bytes(TB, S, H, I, Kp, x_itemsize, mlp_itemsize):
    """Explicit VMEM budget (double-buffered operands + scratch + live temps)."""
    f32 = 4
    dft_ops = 4 * TB * Kp * S * f32                            # cr, ci, ar, ai
    per_layer_w = (2 * Kp * H * f32                            # wr, wi
                   + H * I * mlp_itemsize + I * f32            # w1, bb1
                   + I * H * mlp_itemsize + H * f32            # w2, bb2
                   + 4 * H * f32)                              # g1, b1, g2, b2
    io_blocks = 2 * TB * S * H * x_itemsize                    # x block + out block
    scratch = TB * S * H * f32
    temps = (4 * TB * Kp * H + 2 * TB * S * I + 4 * TB * S * H) * f32
    est = 2 * (dft_ops + per_layer_w + io_blocks) + scratch + temps
    # v5e/v6e: 128 MiB physical VMEM; v7x: 64 MiB -> pick TB so `est` <~ 48 MiB.
    return int(min(100 * 1024 * 1024, max(32 * 1024 * 1024, 1.5 * est)))


def fmlp_encoder_forward(x, params, *, block_b, mlp_mxu_dtype=jnp.float32,
                         output_all_encoded_layers=True, approx_gelu=False):
    """x: (B, S, H).  params: dict of per-layer weight stacks with leading L axis."""
    B, S, H = x.shape
    L, K, _ = params["wr"].shape
    I = params["w1"].shape[2]
    TB = block_b
    assert B % TB == 0, "batch must be divisible by the batch-tile size"
    # TB tuning: aim for TB*S >= 256 (v6e/v7x) / >= 128 (v5e); keep B//TB >= 2 on
    # v7x (2 TensorCores); check _vmem_limit_bytes against the generation's VMEM.
    Kp = _round_up(K, 8)                                       # sublane-aligned freqs

    crT, ciT, arR, aiI = _dft_matrices(S, Kp)
    # Batched (per-sequence) DFT operators broadcast over TB: a few hundred KB,
    # fetched into VMEM once (constant index_map) — no block-diagonal matrices.
    cr_b = jnp.broadcast_to(crT[None], (TB, Kp, S))
    ci_b = jnp.broadcast_to(ciT[None], (TB, Kp, S))
    ar_b = jnp.broadcast_to(arR[None], (TB, S, Kp))
    ai_b = jnp.broadcast_to(aiI[None], (TB, S, Kp))

    # Complex filter stays (L, Kp, H): NOT tiled over TB (broadcast in-kernel).
    pad = ((0, 0), (0, Kp - K), (0, 0))
    wr_p = jnp.pad(params["wr"], pad)
    wi_p = jnp.pad(params["wi"], pad)

    # MLP weights pre-cast in the wrapper (bf16 halves their DMA/VMEM footprint);
    # everything else stays fp32.
    w1 = params["w1"].astype(mlp_mxu_dtype)
    w2 = params["w2"].astype(mlp_mxu_dtype)

    def r3(p):                                  # (L, D) -> (L, 1, D)
        return p.reshape(L, 1, -1)

    def wspec(shape):                           # per-layer weight stack: pick layer l
        nd = len(shape)
        return pl.BlockSpec((1,) + tuple(shape[1:]),
                            lambda b, l, nd=nd: (l,) + (0,) * (nd - 1))

    def cspec(shape):                           # constant operator: same block always
        nd = len(shape)
        return pl.BlockSpec(tuple(shape), lambda b, l, nd=nd: (0,) * nd)

    in_specs = [
        pl.BlockSpec((TB, S, H), lambda b, l: (b, 0, 0)),      # x (read at layer 0)
        cspec(cr_b.shape), cspec(ci_b.shape),                  # rfft operators
        cspec(ar_b.shape), cspec(ai_b.shape),                  # irfft operators
        wspec(wr_p.shape), wspec(wi_p.shape),                  # complex filter
        wspec((L, 1, H)), wspec((L, 1, H)),                    # LayerNorm 1
        wspec(w1.shape), wspec((L, 1, I)),                     # dense_1
        wspec(w2.shape), wspec((L, 1, H)),                     # dense_2
        wspec((L, 1, H)), wspec((L, 1, H)),                    # LayerNorm 2
    ]

    if output_all_encoded_layers:
        out_shape = jax.ShapeDtypeStruct((L, B, S, H), x.dtype)
        out_spec = pl.BlockSpec((1, TB, S, H), lambda b, l: (l, b, 0, 0))
    else:
        out_shape = jax.ShapeDtypeStruct((B, S, H), x.dtype)
        out_spec = pl.BlockSpec((TB, S, H), lambda b, l: (b, 0, 0))

    kernel = functools.partial(fused_encoder_kernel,
                               mlp_dtype=mlp_mxu_dtype,
                               store_every_layer=output_all_encoded_layers,
                               approx_gelu=approx_gelu)

    vmem_limit = _vmem_limit_bytes(TB, S, H, I, Kp, x.dtype.itemsize,
                                   np.dtype(mlp_mxu_dtype).itemsize)

    out = pl.pallas_call(
        kernel,
        out_shape=out_shape,
        grid_spec=pltpu.PrefetchScalarGridSpec(
            num_scalar_prefetch=0,
            grid=(B // TB, L),
            in_specs=in_specs,
            out_specs=out_spec,
            scratch_shapes=[pltpu.VMEM((TB, S, H), jnp.float32)]),
        compiler_params=pltpu.CompilerParams(
            dimension_semantics=("parallel", "arbitrary"),
            vmem_limit_bytes=vmem_limit),
    )(x, cr_b, ci_b, ar_b, ai_b, wr_p, wi_p,
      r3(params["g1"]), r3(params["b1"]),
      w1, r3(params["bb1"]),
      w2, r3(params["bb2"]),
      r3(params["g2"]), r3(params["b2"]))

    if output_all_encoded_layers:
        return [out[l] for l in range(L)]
    return [out]


# ------------------------------ parameter construction ---------------------------
def init_params(key, L, S, H, I):
    K = S // 2 + 1
    k0, k1, k2, k3, k4 = jax.random.split(key, 5)
    cw = jax.random.normal(k0, (K, H, 2), jnp.float32) * 0.02      # complex_weight
    lim1 = 1.0 / math.sqrt(H)
    lim2 = 1.0 / math.sqrt(I)
    one = dict(
        wr=cw[..., 0], wi=cw[..., 1],
        g1=jnp.ones((H,), jnp.float32), b1=jnp.zeros((H,), jnp.float32),
        w1=jax.random.uniform(k1, (H, I), jnp.float32, -lim1, lim1),
        bb1=jax.random.uniform(k2, (I,), jnp.float32, -lim1, lim1),
        w2=jax.random.uniform(k3, (I, H), jnp.float32, -lim2, lim2),
        bb2=jax.random.uniform(k4, (H,), jnp.float32, -lim2, lim2),
        g2=jnp.ones((H,), jnp.float32), b2=jnp.zeros((H,), jnp.float32),
    )
    # copy.deepcopy in the PyTorch Encoder => every layer starts identical.
    return {k: jnp.stack([v] * L, axis=0) for k, v in one.items()}


# ------------------------ pure-JAX reference (real FFT path) ----------------------
def layer_ref(x, p, l):
    S = x.shape[1]
    f = jnp.fft.rfft(x, axis=1, norm="ortho")
    w = p["wr"][l][None] + 1j * p["wi"][l][None]
    y = jnp.fft.irfft(f * w, n=S, axis=1, norm="ortho")
    h = _layernorm(y + x, p["g1"][l], p["b1"][l])
    t = h @ p["w1"][l] + p["bb1"][l]
    t = 0.5 * t * (1.0 + jax.lax.erf(t / math.sqrt(2.0)))
    u = t @ p["w2"][l] + p["bb2"][l]
    return _layernorm(u + h, p["g2"][l], p["b2"][l])


if __name__ == "__main__":
    B, S, H = 4, 16, 64          # small demo shapes (H=64 is FMLP-Rec's default)
    I = 4 * H
    L = 2                        # num_hidden_layers
    TB = 2                       # batch tile -> 2 "parallel" tiles (v7x-friendly)

    key = jax.random.PRNGKey(0)
    kx, kp = jax.random.split(key)
    hidden_states = jax.random.normal(kx, (B, S, H), jnp.float32)
    params = init_params(kp, L, S, H, I)

    # Pure-JAX FFT reference for every layer.
    refs = []
    h_ref = hidden_states
    for l in range(L):
        h_ref = layer_ref(h_ref, params, l)
        refs.append(h_ref)

    # 1) fp32 MXU path, all layers returned — strict numerical check.
    outs = fmlp_encoder_forward(hidden_states, params, block_b=TB,
                                mlp_mxu_dtype=jnp.float32,
                                output_all_encoded_layers=True)
    outs = [jax.block_until_ready(o) for o in outs]
    assert len(outs) == L
    for l in range(L):
        err = float(jnp.max(jnp.abs(outs[l] - refs[l])))
        assert jnp.allclose(outs[l], refs[l], atol=1e-4, rtol=1e-3), (l, err)

    # 2) bf16-MLP path (v6e/v7x throughput config), last layer only — loose check
    #    (DFT/filter stay fp32; bf16 MLP operands add ~1e-3-level error).
    out_last = fmlp_encoder_forward(hidden_states, params, block_b=TB,
                                    mlp_mxu_dtype=jnp.bfloat16,
                                    output_all_encoded_layers=False)[0]
    out_last = jax.block_until_ready(out_last)
    err_bf16 = float(jnp.max(jnp.abs(out_last - refs[-1])))
    assert err_bf16 < 5e-2, err_bf16

    print("KERNEL_OK")
</pallas_src>

<mosaic_0001>
module attributes {stable_mosaic.version = 11 : i64} {
  func.func @fused_encoder_kernel(%arg0: i32, %arg1: i32, %arg2: memref<2x16x64xf32, #tpu.memory_space<vmem>>, %arg3: memref<2x16x16xf32, #tpu.memory_space<vmem>>, %arg4: memref<2x16x16xf32, #tpu.memory_space<vmem>>, %arg5: memref<2x16x16xf32, #tpu.memory_space<vmem>>, %arg6: memref<2x16x16xf32, #tpu.memory_space<vmem>>, %arg7: memref<1x16x64xf32, #tpu.memory_space<vmem>>, %arg8: memref<1x16x64xf32, #tpu.memory_space<vmem>>, %arg9: memref<1x1x64xf32, #tpu.memory_space<vmem>>, %arg10: memref<1x1x64xf32, #tpu.memory_space<vmem>>, %arg11: memref<1x64x256xf32, #tpu.memory_space<vmem>>, %arg12: memref<1x1x256xf32, #tpu.memory_space<vmem>>, %arg13: memref<1x256x64xf32, #tpu.memory_space<vmem>>, %arg14: memref<1x1x64xf32, #tpu.memory_space<vmem>>, %arg15: memref<1x1x64xf32, #tpu.memory_space<vmem>>, %arg16: memref<1x1x64xf32, #tpu.memory_space<vmem>>, %arg17: memref<1x2x16x64xf32, #tpu.memory_space<vmem>>, %arg18: memref<2x16x64xf32, #tpu.memory_space<vmem>>) attributes {dimension_semantics = [#tpu.dimension_semantics<parallel>, #tpu.dimension_semantics<arbitrary>], iteration_bounds = array<i64: 2, 2>, scalar_prefetch = 0 : i64, scratch_operands = 1 : i64, tpu.core_type = #tpu.core_type<tc>, window_params = [{transform_indices = @transform_0, window_bounds = array<i64: 2, 16, 64>}, {pipeline_mode = #tpu.pipeline_mode<synchronous>, transform_indices = @transform_1, window_bounds = array<i64: 2, 16, 16>}, {pipeline_mode = #tpu.pipeline_mode<synchronous>, transform_indices = @transform_2, window_bounds = array<i64: 2, 16, 16>}, {pipeline_mode = #tpu.pipeline_mode<synchronous>, transform_indices = @transform_3, window_bounds = array<i64: 2, 16, 16>}, {pipeline_mode = #tpu.pipeline_mode<synchronous>, transform_indices = @transform_4, window_bounds = array<i64: 2, 16, 16>}, {transform_indices = @transform_5, window_bounds = array<i64: 1, 16, 64>}, {transform_indices = @transform_6, window_bounds = array<i64: 1, 16, 64>}, {transform_indices = @transform_7, window_bounds = array<i64: 1, 1, 64>}, {transform_indices = @transform_8, window_bounds = array<i64: 1, 1, 64>}, {transform_indices = @transform_9, window_bounds = array<i64: 1, 64, 256>}, {transform_indices = @transform_10, window_bounds = array<i64: 1, 1, 256>}, {transform_indices = @transform_11, window_bounds = array<i64: 1, 256, 64>}, {transform_indices = @transform_12, window_bounds = array<i64: 1, 1, 64>}, {transform_indices = @transform_13, window_bounds = array<i64: 1, 1, 64>}, {transform_indices = @transform_14, window_bounds = array<i64: 1, 1, 64>}, {transform_indices = @transform_15, window_bounds = array<i64: 1, 2, 16, 64>}]} {
    %c0_i32 = arith.constant 0 : i32
    %0 = arith.cmpi eq, %arg1, %c0_i32 : i32
    %1 = arith.extui %0 : i1 to i32
    %c0_i32_0 = arith.constant 0 : i32
    %2 = arith.cmpi ne, %1, %c0_i32_0 : i32
    scf.if %2 {
      %c0_87 = arith.constant 0 : index
      %c0_88 = arith.constant 0 : index
      %c0_89 = arith.constant 0 : index
      %162 = vector.load %arg2[%c0_87, %c0_88, %c0_89] : memref<2x16x64xf32, #tpu.memory_space<vmem>>, vector<2x16x64xf32>
      %c0_90 = arith.constant 0 : index
      %c0_91 = arith.constant 0 : index
      %c0_92 = arith.constant 0 : index
      %163 = vector.load %arg18[%c0_90, %c0_91, %c0_92] : memref<2x16x64xf32, #tpu.memory_space<vmem>>, vector<2x16x64xf32>
      tpu.vector_store %arg18[%c0_90, %c0_91, %c0_92], %162 {strides = array<i32>} : memref<2x16x64xf32, #tpu.memory_space<vmem>>, vector<2x16x64xf32>,
    } else {
    }
    %c0 = arith.constant 0 : index
    %c0_1 = arith.constant 0 : index
    %c0_2 = arith.constant 0 : index
    %3 = vector.load %arg18[%c0, %c0_1, %c0_2] : memref<2x16x64xf32, #tpu.memory_space<vmem>>, vector<2x16x64xf32>
    %c0_3 = arith.constant 0 : index
    %c0_4 = arith.constant 0 : index
    %c0_5 = arith.constant 0 : index
    %4 = vector.load %arg3[%c0_3, %c0_4, %c0_5] : memref<2x16x16xf32, #tpu.memory_space<vmem>>, vector<2x16x16xf32>
    %cst = arith.constant dense<0.000000e+00> : vector<2x16x64xf32>
    %5 = tpu.matmul %4, %3, %cst {dimension_numbers = #tpu.dot_dimension_numbers<[2], [1], [1], [2], [0, 0, 0, 1, 1, 2], [0], [0]>} : vector<2x16x16xf32>, vector<2x16x64xf32>, vector<2x16x64xf32> -> vector<2x16x64xf32>
    %c0_6 = arith.constant 0 : index
    %c0_7 = arith.constant 0 : index
    %c0_8 = arith.constant 0 : index
    %6 = vector.load %arg4[%c0_6, %c0_7, %c0_8] : memref<2x16x16xf32, #tpu.memory_space<vmem>>, vector<2x16x16xf32>
    %cst_9 = arith.constant dense<0.000000e+00> : vector<2x16x64xf32>
    %7 = tpu.matmul %6, %3, %cst_9 {dimension_numbers = #tpu.dot_dimension_numbers<[2], [1], [1], [2], [0, 0, 0, 1, 1, 2], [0], [0]>} : vector<2x16x16xf32>, vector<2x16x64xf32>, vector<2x16x64xf32> -> vector<2x16x64xf32>
    %c0_10 = arith.constant 0 : index
    %c0_11 = arith.constant 0 : index
    %c0_12 = arith.constant 0 : index
    %8 = vector.load %arg7[%c0_10, %c0_11, %c0_12] : memref<1x16x64xf32, #tpu.memory_space<vmem>>, vector<1x16x64xf32>
    %9 = vector.shape_cast %8 : vector<1x16x64xf32> to vector<16x64xf32>
    %10 = vector.shape_cast %9 : vector<16x64xf32> to vector<1x16x64xf32>
    %c0_13 = arith.constant 0 : index
    %c0_14 = arith.constant 0 : index
    %c0_15 = arith.constant 0 : index
    %11 = vector.load %arg8[%c0_13, %c0_14, %c0_15] : memref<1x16x64xf32, #tpu.memory_space<vmem>>, vector<1x16x64xf32>
    %12 = vector.shape_cast %11 : vector<1x16x64xf32> to vector<16x64xf32>
    %13 = vector.shape_cast %12 : vector<16x64xf32> to vector<1x16x64xf32>
    %14 = vector.broadcast %10 : vector<1x16x64xf32> to vector<2x16x64xf32>
    %15 = arith.mulf %5, %14 : vector<2x16x64xf32>
    %16 = vector.broadcast %13 : vector<1x16x64xf32> to vector<2x16x64xf32>
    %17 = arith.mulf %7, %16 : vector<2x16x64xf32>
    %18 = arith.subf %15, %17 : vector<2x16x64xf32>
    %19 = vector.broadcast %13 : vector<1x16x64xf32> to vector<2x16x64xf32>
    %20 = arith.mulf %5, %19 : vector<2x16x64xf32>
    %21 = vector.broadcast %10 : vector<1x16x64xf32> to vector<2x16x64xf32>
    %22 = arith.mulf %7, %21 : vector<2x16x64xf32>
    %23 = arith.addf %20, %22 : vector<2x16x64xf32>
    %c0_16 = arith.constant 0 : index
    %c0_17 = arith.constant 0 : index
    %c0_18 = arith.constant 0 : index
    %24 = vector.load %arg5[%c0_16, %c0_17, %c0_18] : memref<2x16x16xf32, #tpu.memory_space<vmem>>, vector<2x16x16xf32>
    %cst_19 = arith.constant dense<0.000000e+00> : vector<2x16x64xf32>
    %25 = tpu.matmul %24, %18, %cst_19 {dimension_numbers = #tpu.dot_dimension_numbers<[2], [1], [1], [2], [0, 0, 0, 1, 1, 2], [0], [0]>} : vector<2x16x16xf32>, vector<2x16x64xf32>, vector<2x16x64xf32> -> vector<2x16x64xf32>
    %c0_20 = arith.constant 0 : index
    %c0_21 = arith.constant 0 : index
    %c0_22 = arith.constant 0 : index
    %26 = vector.load %arg6[%c0_20, %c0_21, %c0_22] : memref<2x16x16xf32, #tpu.memory_space<vmem>>, vector<2x16x16xf32>
    %cst_23 = arith.constant dense<0.000000e+00> : vector<2x16x64xf32>
    %27 = tpu.matmul %26, %23, %cst_23 {dimension_numbers = #tpu.dot_dimension_numbers<[2], [1], [1], [2], [0, 0, 0, 1, 1, 2], [0], [0]>} : vector<2x16x16xf32>, vector<2x16x64xf32>, vector<2x16x64xf32> -> vector<2x16x64xf32>
    %28 = arith.addf %25, %27 : vector<2x16x64xf32>
    %29 = arith.addf %28, %3 : vector<2x16x64xf32>
    %c0_24 = arith.constant 0 : index
    %c0_25 = arith.constant 0 : index
    %c0_26 = arith.constant 0 : index
    %30 = vector.load %arg9[%c0_24, %c0_25, %c0_26] : memref<1x1x64xf32, #tpu.memory_space<vmem>>, vector<1x1x64xf32>
    %31 = vector.shape_cast %30 : vector<1x1x64xf32> to vector<1x64xf32>
    %c0_27 = arith.constant 0 : index
    %c0_28 = arith.constant 0 : index
    %c0_29 = arith.constant 0 : index
    %32 = vector.load %arg10[%c0_27, %c0_28, %c0_29] : memref<1x1x64xf32, #tpu.memory_space<vmem>>, vector<1x1x64xf32>
    %33 = vector.shape_cast %32 : vector<1x1x64xf32> to vector<1x64xf32>
    %cst_30 = arith.constant dense<0.000000e+00> : vector<2x16xf32>
    %34 = vector.multi_reduction <add>, %29, %cst_30 [2] : vector<2x16x64xf32> to vector<2x16xf32>
    %35 = vector.shape_cast %34 : vector<2x16xf32> to vector<2x16x1xf32>
    %cst_31 = arith.constant 6.400000e+01 : f32
    %36 = vector.broadcast %cst_31 : f32 to vector<2x16x1xf32>
    %37 = arith.divf %35, %36 : vector<2x16x1xf32>
    %38 = vector.broadcast %37 : vector<2x16x1xf32> to vector<2x16x64xf32>
    %39 = arith.subf %29, %38 : vector<2x16x64xf32>
    %40 = arith.mulf %39, %39 : vector<2x16x64xf32>
    %cst_32 = arith.constant dense<0.000000e+00> : vector<2x16xf32>
    %41 = vector.multi_reduction <add>, %40, %cst_32 [2] : vector<2x16x64xf32> to vector<2x16xf32>
    %42 = vector.shape_cast %41 : vector<2x16xf32> to vector<2x16x1xf32>
    %cst_33 = arith.constant 6.400000e+01 : f32
    %43 = vector.broadcast %cst_33 : f32 to vector<2x16x1xf32>
    %44 = arith.divf %42, %43 : vector<2x16x1xf32>
    %45 = vector.broadcast %37 : vector<2x16x1xf32> to vector<2x16x64xf32>
    %46 = arith.subf %29, %45 : vector<2x16x64xf32>
    %cst_34 = arith.constant 9.99999996E-13 : f32
    %47 = vector.broadcast %cst_34 : f32 to vector<2x16x1xf32>
    %48 = arith.addf %44, %47 : vector<2x16x1xf32>
    %49 = math.rsqrt %48 : vector<2x16x1xf32>
    %50 = vector.broadcast %49 : vector<2x16x1xf32> to vector<2x16x64xf32>
    %51 = arith.mulf %46, %50 : vector<2x16x64xf32>
    %52 = vector.shape_cast %31 : vector<1x64xf32> to vector<1x1x64xf32>
    %53 = vector.broadcast %52 : vector<1x1x64xf32> to vector<2x16x64xf32>
    %54 = arith.mulf %53, %51 : vector<2x16x64xf32>
    %55 = vector.shape_cast %33 : vector<1x64xf32> to vector<1x1x64xf32>
    %56 = vector.broadcast %55 : vector<1x1x64xf32> to vector<2x16x64xf32>
    %57 = arith.addf %54, %56 : vector<2x16x64xf32>
    %58 = vector.shape_cast %57 : vector<2x16x64xf32> to vector<32x64xf32>
    %c0_35 = arith.constant 0 : index
    %c0_36 = arith.constant 0 : index
    %c0_37 = arith.constant 0 : index
    %59 = vector.load %arg11[%c0_35, %c0_36, %c0_37] : memref<1x64x256xf32, #tpu.memory_space<vmem>>, vector<1x64x256xf32>
    %60 = vector.shape_cast %59 : vector<1x64x256xf32> to vector<64x256xf32>
    %cst_38 = arith.constant dense<0.000000e+00> : vector<32x256xf32>
    %61 = tpu.matmul %58, %60, %cst_38 {dimension_numbers = #tpu.dot_dimension_numbers<[1], [0], [0], [1], [0, 0, 1, 1], [], []>} : vector<32x64xf32>, vector<64x256xf32>, vector<32x256xf32> -> vector<32x256xf32>
    %c0_39 = arith.constant 0 : index
    %c0_40 = arith.constant 0 : index
    %c0_41 = arith.constant 0 : index
    %62 = vector.load %arg12[%c0_39, %c0_40, %c0_41] : memref<1x1x256xf32, #tpu.memory_space<vmem>>, vector<1x1x256xf32>
    %63 = vector.shape_cast %62 : vector<1x1x256xf32> to vector<1x256xf32>
    %64 = vector.broadcast %63 : vector<1x256xf32> to vector<32x256xf32>
    %65 = arith.addf %61, %64 : vector<32x256xf32>
    %cst_42 = arith.constant 5.000000e-01 : f32
    %66 = vector.broadcast %cst_42 : f32 to vector<32x256xf32>
    %67 = arith.mulf %66, %65 : vector<32x256xf32>
    %cst_43 = arith.constant 0.707106769 : f32
    %68 = vector.broadcast %cst_43 : f32 to vector<32x256xf32>
    %69 = arith.mulf %65, %68 : vector<32x256xf32>
    %70 = math.absf %69 : vector<32x256xf32>
    %cst_44 = arith.constant 5.000000e-01 : f32
    %71 = vector.broadcast %cst_44 : f32 to vector<32x256xf32>
    %72 = arith.mulf %71, %70 : vector<32x256xf32>
    %cst_45 = arith.constant 1.000000e+00 : f32
    %73 = vector.broadcast %cst_45 : f32 to vector<32x256xf32>
    %74 = arith.addf %73, %72 : vector<32x256xf32>
    %cst_46 = arith.constant 1.000000e+00 : f32
    %75 = vector.broadcast %cst_46 : f32 to vector<32x256xf32>
    %76 = arith.divf %75, %74 : vector<32x256xf32>
    %cst_47 = arith.constant 0.000000e+00 : f32
    %77 = vector.broadcast %cst_47 : f32 to vector<32x256xf32>
    %78 = arith.subf %77, %70 : vector<32x256xf32>
    %79 = arith.mulf %78, %70 : vector<32x256xf32>
    %cst_48 = arith.constant 1.26551223 : f32
    %80 = vector.broadcast %cst_48 : f32 to vector<32x256xf32>
    %81 = arith.subf %79, %80 : vector<32x256xf32>
    %cst_49 = arith.constant 0.170872763 : f32
    %82 = vector.broadcast %cst_49 : f32 to vector<32x256xf32>
    %83 = arith.mulf %76, %82 : vector<32x256xf32>
    %cst_50 = arith.constant -0.822152256 : f32
    %84 = vector.broadcast %cst_50 : f32 to vector<32x256xf32>
    %85 = arith.addf %84, %83 : vector<32x256xf32>
    %86 = arith.mulf %76, %85 : vector<32x256xf32>
    %cst_51 = arith.constant 1.48851585 : f32
    %87 = vector.broadcast %cst_51 : f32 to vector<32x256xf32>
    %88 = arith.addf %87, %86 : vector<32x256xf32>
    %89 = arith.mulf %76, %88 : vector<32x256xf32>
    %cst_52 = arith.constant -1.13520396 : f32
    %90 = vector.broadcast %cst_52 : f32 to vector<32x256xf32>
    %91 = arith.addf %90, %89 : vector<32x256xf32>
    %92 = arith.mulf %76, %91 : vector<32x256xf32>
    %cst_53 = arith.constant 0.278868079 : f32
    %93 = vector.broadcast %cst_53 : f32 to vector<32x256xf32>
    %94 = arith.addf %93, %92 : vector<32x256xf32>
    %95 = arith.mulf %76, %94 : vector<32x256xf32>
    %cst_54 = arith.constant -0.186288059 : f32
    %96 = vector.broadcast %cst_54 : f32 to vector<32x256xf32>
    %97 = arith.addf %96, %95 : vector<32x256xf32>
    %98 = arith.mulf %76, %97 : vector<32x256xf32>
    %cst_55 = arith.constant 0.0967841818 : f32
    %99 = vector.broadcast %cst_55 : f32 to vector<32x256xf32>
    %100 = arith.addf %99, %98 : vector<32x256xf32>
    %101 = arith.mulf %76, %100 : vector<32x256xf32>
    %cst_56 = arith.constant 0.374091953 : f32
    %102 = vector.broadcast %cst_56 : f32 to vector<32x256xf32>
    %103 = arith.addf %102, %101 : vector<32x256xf32>
    %104 = arith.mulf %76, %103 : vector<32x256xf32>
    %cst_57 = arith.constant 1.00002372 : f32
    %105 = vector.broadcast %cst_57 : f32 to vector<32x256xf32>
    %106 = arith.addf %105, %104 : vector<32x256xf32>
    %107 = arith.mulf %76, %106 : vector<32x256xf32>
    %108 = arith.addf %81, %107 : vector<32x256xf32>
    %109 = math.exp %108 : vector<32x256xf32>
    %110 = arith.mulf %76, %109 : vector<32x256xf32>
    %cst_58 = arith.constant 0.000000e+00 : f32
    %111 = vector.broadcast %cst_58 : f32 to vector<32x256xf32>
    %112 = arith.cmpf oge, %69, %111 : vector<32x256xf32>
    %cst_59 = arith.constant 1.000000e+00 : f32
    %113 = vector.broadcast %cst_59 : f32 to vector<32x256xf32>
    %114 = arith.subf %113, %110 : vector<32x256xf32>
    %cst_60 = arith.constant 1.000000e+00 : f32
    %115 = vector.broadcast %cst_60 : f32 to vector<32x256xf32>
    %116 = arith.subf %110, %115 : vector<32x256xf32>
    %117 = arith.select %112, %114, %116 : vector<32x256xi1>, vector<32x256xf32>
    %cst_61 = arith.constant 1.000000e+00 : f32
    %118 = vector.broadcast %cst_61 : f32 to vector<32x256xf32>
    %119 = arith.addf %118, %117 : vector<32x256xf32>
    %120 = arith.mulf %67, %119 : vector<32x256xf32>
    %c0_62 = arith.constant 0 : index
    %c0_63 = arith.constant 0 : index
    %c0_64 = arith.constant 0 : index
    %121 = vector.load %arg13[%c0_62, %c0_63, %c0_64] : memref<1x256x64xf32, #tpu.memory_space<vmem>>, vector<1x256x64xf32>
    %122 = vector.shape_cast %121 : vector<1x256x64xf32> to vector<256x64xf32>
    %cst_65 = arith.constant dense<0.000000e+00> : vector<32x64xf32>
    %123 = tpu.matmul %120, %122, %cst_65 {dimension_numbers = #tpu.dot_dimension_numbers<[1], [0], [0], [1], [0, 0, 1, 1], [], []>} : vector<32x256xf32>, vector<256x64xf32>, vector<32x64xf32> -> vector<32x64xf32>
    %c0_66 = arith.constant 0 : index
    %c0_67 = arith.constant 0 : index
    %c0_68 = arith.constant 0 : index
    %124 = vector.load %arg14[%c0_66, %c0_67, %c0_68] : memref<1x1x64xf32, #tpu.memory_space<vmem>>, vector<1x1x64xf32>
    %125 = vector.shape_cast %124 : vector<1x1x64xf32> to vector<1x64xf32>
    %126 = vector.broadcast %125 : vector<1x64xf32> to vector<32x64xf32>
    %127 = arith.addf %123, %126 : vector<32x64xf32>
    %128 = vector.shape_cast %127 : vector<32x64xf32> to vector<2x16x64xf32>
    %129 = arith.addf %128, %57 : vector<2x16x64xf32>
    %c0_69 = arith.constant 0 : index
    %c0_70 = arith.constant 0 : index
    %c0_71 = arith.constant 0 : index
    %130 = vector.load %arg15[%c0_69, %c0_70, %c0_71] : memref<1x1x64xf32, #tpu.memory_space<vmem>>, vector<1x1x64xf32>
    %131 = vector.shape_cast %130 : vector<1x1x64xf32> to vector<1x64xf32>
    %c0_72 = arith.constant 0 : index
    %c0_73 = arith.constant 0 : index
    %c0_74 = arith.constant 0 : index
    %132 = vector.load %arg16[%c0_72, %c0_73, %c0_74] : memref<1x1x64xf32, #tpu.memory_space<vmem>>, vector<1x1x64xf32>
    %133 = vector.shape_cast %132 : vector<1x1x64xf32> to vector<1x64xf32>
    %cst_75 = arith.constant dense<0.000000e+00> : vector<2x16xf32>
    %134 = vector.multi_reduction <add>, %129, %cst_75 [2] : vector<2x16x64xf32> to vector<2x16xf32>
    %135 = vector.shape_cast %134 : vector<2x16xf32> to vector<2x16x1xf32>
    %cst_76 = arith.constant 6.400000e+01 : f32
    %136 = vector.broadcast %cst_76 : f32 to vector<2x16x1xf32>
    %137 = arith.divf %135, %136 : vector<2x16x1xf32>
    %138 = vector.broadcast %137 : vector<2x16x1xf32> to vector<2x16x64xf32>
    %139 = arith.subf %129, %138 : vector<2x16x64xf32>
    %140 = arith.mulf %139, %139 : vector<2x16x64xf32>
    %cst_77 = arith.constant dense<0.000000e+00> : vector<2x16xf32>
    %141 = vector.multi_reduction <add>, %140, %cst_77 [2] : vector<2x16x64xf32> to vector<2x16xf32>
    %142 = vector.shape_cast %141 : vector<2x16xf32> to vector<2x16x1xf32>
    %cst_78 = arith.constant 6.400000e+01 : f32
    %143 = vector.broadcast %cst_78 : f32 to vector<2x16x1xf32>
    %144 = arith.divf %142, %143 : vector<2x16x1xf32>
    %145 = vector.broadcast %137 : vector<2x16x1xf32> to vector<2x16x64xf32>
    %146 = arith.subf %129, %145 : vector<2x16x64xf32>
    %cst_79 = arith.constant 9.99999996E-13 : f32
    %147 = vector.broadcast %cst_79 : f32 to vector<2x16x1xf32>
    %148 = arith.addf %144, %147 : vector<2x16x1xf32>
    %149 = math.rsqrt %148 : vector<2x16x1xf32>
    %150 = vector.broadcast %149 : vector<2x16x1xf32> to vector<2x16x64xf32>
    %151 = arith.mulf %146, %150 : vector<2x16x64xf32>
    %152 = vector.shape_cast %131 : vector<1x64xf32> to vector<1x1x64xf32>
    %153 = vector.broadcast %152 : vector<1x1x64xf32> to vector<2x16x64xf32>
    %154 = arith.mulf %153, %151 : vector<2x16x64xf32>
    %155 = vector.shape_cast %133 : vector<1x64xf32> to vector<1x1x64xf32>
    %156 = vector.broadcast %155 : vector<1x1x64xf32> to vector<2x16x64xf32>
    %157 = arith.addf %154, %156 : vector<2x16x64xf32>
    %c0_80 = arith.constant 0 : index
    %c0_81 = arith.constant 0 : index
    %c0_82 = arith.constant 0 : index
    %158 = vector.load %arg18[%c0_80, %c0_81, %c0_82] : memref<2x16x64xf32, #tpu.memory_space<vmem>>, vector<2x16x64xf32>
    tpu.vector_store %arg18[%c0_80, %c0_81, %c0_82], %157 {strides = array<i32>} : memref<2x16x64xf32, #tpu.memory_space<vmem>>, vector<2x16x64xf32>,
    %c0_83 = arith.constant 0 : index
    %c0_84 = arith.constant 0 : index
    %c0_85 = arith.constant 0 : index
    %c0_86 = arith.constant 0 : index
    %159 = vector.load %arg17[%c0_83, %c0_84, %c0_85, %c0_86] : memref<1x2x16x64xf32, #tpu.memory_space<vmem>>, vector<1x2x16x64xf32>
    %160 = vector.shape_cast %159 : vector<1x2x16x64xf32> to vector<2x16x64xf32>
    %161 = vector.shape_cast %157 : vector<2x16x64xf32> to vector<1x2x16x64xf32>
    tpu.vector_store %arg17[%c0_83, %c0_84, %c0_85, %c0_86], %161 {strides = array<i32>} : memref<1x2x16x64xf32, #tpu.memory_space<vmem>>, vector<1x2x16x64xf32>,
    return
  }
  func.func @transform_0(%arg0: i32, %arg1: i32) -> (i32, i32, i32) {
    %c0_i32 = arith.constant 0 : i32
    %c0_i32_0 = arith.constant 0 : i32
    %c0_i32_1 = arith.constant 0 : i32
    return %arg0, %c0_i32, %c0_i32_0 : i32, i32, i32
  }
  func.func @transform_1(%arg0: i32, %arg1: i32) -> (i32, i32, i32) {
    %c0_i32 = arith.constant 0 : i32
    %c0_i32_0 = arith.constant 0 : i32
    %c0_i32_1 = arith.constant 0 : i32
    %c0_i32_2 = arith.constant 0 : i32
    return %c0_i32, %c0_i32_0, %c0_i32_1 : i32, i32, i32
  }
  func.func @transform_2(%arg0: i32, %arg1: i32) -> (i32, i32, i32) {
    %c0_i32 = arith.constant 0 : i32
    %c0_i32_0 = arith.constant 0 : i32
    %c0_i32_1 = arith.constant 0 : i32
    %c0_i32_2 = arith.constant 0 : i32
    return %c0_i32, %c0_i32_0, %c0_i32_1 : i32, i32, i32
  }
  func.func @transform_3(%arg0: i32, %arg1: i32) -> (i32, i32, i32) {
    %c0_i32 = arith.constant 0 : i32
    %c0_i32_0 = arith.constant 0 : i32
    %c0_i32_1 = arith.constant 0 : i32
    %c0_i32_2 = arith.constant 0 : i32
    return %c0_i32, %c0_i32_0, %c0_i32_1 : i32, i32, i32
  }
  func.func @transform_4(%arg0: i32, %arg1: i32) -> (i32, i32, i32) {
    %c0_i32 = arith.constant 0 : i32
    %c0_i32_0 = arith.constant 0 : i32
    %c0_i32_1 = arith.constant 0 : i32
    %c0_i32_2 = arith.constant 0 : i32
    return %c0_i32, %c0_i32_0, %c0_i32_1 : i32, i32, i32
  }
  func.func @transform_5(%arg0: i32, %arg1: i32) -> (i32, i32, i32) {
    %c0_i32 = arith.constant 0 : i32
    %c0_i32_0 = arith.constant 0 : i32
    %c0_i32_1 = arith.constant 0 : i32
    return %arg1, %c0_i32, %c0_i32_0 : i32, i32, i32
  }
  func.func @transform_6(%arg0: i32, %arg1: i32) -> (i32, i32, i32) {
    %c0_i32 = arith.constant 0 : i32
    %c0_i32_0 = arith.constant 0 : i32
    %c0_i32_1 = arith.constant 0 : i32
    return %arg1, %c0_i32, %c0_i32_0 : i32, i32, i32
  }
  func.func @transform_7(%arg0: i32, %arg1: i32) -> (i32, i32, i32) {
    %c0_i32 = arith.constant 0 : i32
    %c0_i32_0 = arith.constant 0 : i32
    %c0_i32_1 = arith.constant 0 : i32
    return %arg1, %c0_i32, %c0_i32_0 : i32, i32, i32
  }
  func.func @transform_8(%arg0: i32, %arg1: i32) -> (i32, i32, i32) {
    %c0_i32 = arith.constant 0 : i32
    %c0_i32_0 = arith.constant 0 : i32
    %c0_i32_1 = arith.constant 0 : i32
    return %arg1, %c0_i32, %c0_i32_0 : i32, i32, i32
  }
  func.func @transform_9(%arg0: i32, %arg1: i32) -> (i32, i32, i32) {
    %c0_i32 = arith.constant 0 : i32
    %c0_i32_0 = arith.constant 0 : i32
    %c0_i32_1 = arith.constant 0 : i32
    return %arg1, %c0_i32, %c0_i32_0 : i32, i32, i32
  }
  func.func @transform_10(%arg0: i32, %arg1: i32) -> (i32, i32, i32) {
    %c0_i32 = arith.constant 0 : i32
    %c0_i32_0 = arith.constant 0 : i32
    %c0_i32_1 = arith.constant 0 : i32
    return %arg1, %c0_i32, %c0_i32_0 : i32, i32, i32
  }
  func.func @transform_11(%arg0: i32, %arg1: i32) -> (i32, i32, i32) {
    %c0_i32 = arith.constant 0 : i32
    %c0_i32_0 = arith.constant 0 : i32
    %c0_i32_1 = arith.constant 0 : i32
    return %arg1, %c0_i32, %c0_i32_0 : i32, i32, i32
  }
  func.func @transform_12(%arg0: i32, %arg1: i32) -> (i32, i32, i32) {
    %c0_i32 = arith.constant 0 : i32
    %c0_i32_0 = arith.constant 0 : i32
    %c0_i32_1 = arith.constant 0 : i32
    return %arg1, %c0_i32, %c0_i32_0 : i32, i32, i32
  }
  func.func @transform_13(%arg0: i32, %arg1: i32) -> (i32, i32, i32) {
    %c0_i32 = arith.constant 0 : i32
    %c0_i32_0 = arith.constant 0 : i32
    %c0_i32_1 = arith.constant 0 : i32
    return %arg1, %c0_i32, %c0_i32_0 : i32, i32, i32
  }
  func.func @transform_14(%arg0: i32, %arg1: i32) -> (i32, i32, i32) {
    %c0_i32 = arith.constant 0 : i32
    %c0_i32_0 = arith.constant 0 : i32
    %c0_i32_1 = arith.constant 0 : i32
    return %arg1, %c0_i32, %c0_i32_0 : i32, i32, i32
  }
  func.func @transform_15(%arg0: i32, %arg1: i32) -> (i32, i32, i32, i32) {
    %c0_i32 = arith.constant 0 : i32
    %c0_i32_0 = arith.constant 0 : i32
    %c0_i32_1 = arith.constant 0 : i32
    return %arg1, %arg0, %c0_i32, %c0_i32_0 : i32, i32, i32, i32
  }
}

</mosaic_0001>

<bundles_post_ra>
// kernel: tpu_custom_call.1
= control target key start
LH: loop header
LB: loop body
LE: loop exit
PB: predicated region body
PF: predicated region fallthrough
CT: control target
= control target key end

     0   :  { %s3525_s0 = inlined_call_operand.vmem [shape: f32[4,16,64], index: 0, kind: input, shape index: {}]   ;;  %s3526_s1 = inlined_call_operand.vmem [shape: f32[2,16,16], index: 1, kind: input, shape index: {}]   ;;  %s3527_s2 = inlined_call_operand.vmem [shape: f32[2,16,16], index: 2, kind: input, shape index: {}]   ;;  %s3528_s3 = inlined_call_operand.vmem [shape: f32[2,16,16], index: 3, kind: input, shape index: {}]   ;;  %s3529_s4 = inlined_call_operand.vmem [shape: f32[2,16,16], index: 4, kind: input, shape index: {}]   ;;  %s3530_s5 = inlined_call_operand.vmem [shape: f32[2,16,64], index: 5, kind: input, shape index: {}]   ;;  %s3531_s6 = inlined_call_operand.vmem [shape: f32[2,16,64], index: 6, kind: input, shape index: {}]   ;;  %s3532_s7 = inlined_call_operand.vmem [shape: f32[2,1,64], index: 7, kind: input, shape index: {}]   ;;  %s3533_s8 = inlined_call_operand.vmem [shape: f32[2,1,64], index: 8, kind: input, shape index: {}]   ;;  %s3534_s9 = inlined_call_operand.vmem [shape: f32[2,64,256], index: 9, kind: input, shape index: {}]   ;;  %s3535_s10 = inlined_call_operand.vmem [shape: f32[2,1,256], index: 10, kind: input, shape index: {}]   ;;  %s3536_s11 = inlined_call_operand.vmem [shape: f32[2,256,64], index: 11, kind: input, shape index: {}]   ;;  %s3537_s12 = inlined_call_operand.vmem [shape: f32[2,1,64], index: 12, kind: input, shape index: {}]   ;;  %s3538_s13 = inlined_call_operand.vmem [shape: f32[2,1,64], index: 13, kind: input, shape index: {}]   ;;  %s3539_s14 = inlined_call_operand.vmem [shape: f32[2,1,64], index: 14, kind: input, shape index: {}]   ;;  %s3540_s15 = inlined_call_operand.hbm [shape: f32[2,4,16,64], index: 15, kind: output, shape index: {}]  }
   0x1   :  { %3560 = sst [smem:[#allocation18_spill]] %s3525_s0 }
   0x2   :  { %3561 = sst [smem:[#allocation19_spill]] %s3526_s1 }
   0x3   :  { %3562 = sst [smem:[#allocation20_spill]] %s3527_s2 }
   0x4   :  { %3563 = sst [smem:[#allocation21_spill]] %s3528_s3 }
   0x5   :  { %3564 = sst [smem:[#allocation22_spill]] %s3529_s4 }
   0x6   :  { %3565 = sst [smem:[#allocation23_spill]] %s3530_s5 }
   0x7   :  { %3566 = sst [smem:[#allocation24_spill]] %s3531_s6 }
   0x8   :  { %3567 = sst [smem:[#allocation25_spill]] %s3540_s15 }
   0x9   :  { %20 = vsyncpa [#allocation4], 0 }
   0xa   :  { %22 = vsyncpa [#allocation4 + $0x1], 0  ;;  %s2894_s18 = smov 0   ;;  %s2896_s19 = smov 0  }
   0xb   :  { %s2898_s20 = smov 0   ;;  %s2900_s21 = smov 0  }
   0xc   :  { %s2902_s22 = smov 0   ;;  %s2904_s23 = smov 0  }
   0xd   :  { %s2906_s24 = smov 0   ;;  %s2908_s25 = smov 0  }
   0xe LB: > { %3568 = sst [smem:[#allocation6_spill]] %s2780_s18  ;;  %s2303_s26 = sadd.s32 4294967295, %s2808_s25   ;;  %s2808_s25 = sphi %s2908_s25, %s28_s25   ;;  %s2804_s24 = sphi %s2906_s24, %s3607_s24   ;;  %s2800_s23 = sphi %s2904_s23, %s3606_s23   ;;  %s2796_s22 = sphi %s2902_s22, %s3605_s22   ;;  %s2792_s21 = sphi %s2900_s21, %s3604_s21   ;;  %s2788_s20 = sphi %s2898_s20, %s3603_s20   ;;  %s2784_s19 = sphi %s2896_s19, %s3602_s19   ;;  %s2780_s18 = sphi %s2894_s18, %s3601_s18  }
   0xf   : > { %3569 = sst [smem:[#allocation7_spill]] %s2784_s19  ;;  %s2304_s27 = sadd.s32 4294967294, %s2808_s25  }
  0x10   : > { %3570 = sst [smem:[#allocation8_spill]] %s2788_s20  ;;  %s37_s28 = sadd.s32 1, %s2800_s23 }
  0x11   : > { %3571 = sst [smem:[#allocation9_spill]] %s2796_s22  ;;  %p38_p0 = scmp.ge.s32.totalorder %s37_s28, 2 }
  0x12   : > { %3572 = sst [smem:[#allocation10_spill]] %s2800_s23  ;;  %s40_s29 = sadd.s32 1, %s2804_s24 }
  0x13   : > { %3573 = sst [smem:[#allocation11_spill]] %s2804_s24  ;;  %p429_p1 = scmp.ne.s32.totalorder %s2788_s20, %s2784_s19 }
  0x14   : > { %3574 = sst [smem:[#allocation12_spill]] %s2808_s25  ;;  %p430_p2 = scmp.eq.s32.totalorder %s2303_s26, 3 }
  0x15   : > { %s3609_s28 = smov (%p38_p0, %s37_s28), 0  ;;  %s3611_s29 = smov (!%p38_p0, %s40_s29), %s2804_s24 }
  0x16   : > { %3575 = sst [smem:[#allocation13_spill]] %s3609_s28  ;;  %s414_s30 = ssub.s32 %s2800_s23, %s3609_s28 }
  0x17   : > { %p2945_p3 = por %p430_p2, %p429_p1  ;;  %p42_p4 = scmp.ge.s32.totalorder %s3611_s29, 2 }
  0x18   : > { %p435_p5 = scmp.ne.s32.totalorder %s2784_s19, %s2780_s18  ;;  %p436_p6 = scmp.eq.s32.totalorder %s2304_s27, 3 }
  0x19   : > { %s3576_s16 = scalar_select %p2945_p3, 1, 0 }
  0x1a   : > { %p2307_p7 = scmp.ge.s32.totalorder %s2808_s25, 1  ;;  %s3613_s29 = smov (%p42_p4, %s3611_s29), 0 }
  0x1b   : > { %3577 = sst [smem:[#allocation14_spill]] %s3576_s16  ;;  %p2954_p8 = por %p436_p6, %p435_p5 }
  0x1c   : > { %3578 = sst [smem:[#allocation15_spill]] %s3613_s29  ;;  %p545_p9 = scmp.lt.s32.totalorder %s2808_s25, 5 }
  0x1d   : > { %s3579_s17 = scalar_select %p2954_p8, 1, 0 }
  0x1e   : > { %s415_s26 = ssub.s32 %s2804_s24, %s3613_s29  ;;  %s419_s15 = sadd.s32 1, %s2788_s20 }
  0x1f   : > { %3580 = sst [smem:[#allocation16_spill]] %s3579_s17  ;;  %s416_s3 = sor.u32 %s415_s26, %s414_s30 }
  0x20   : > { %p546_p10 = pnand %p2307_p7, %p545_p9  ;;  %p417_p11 = scmp.eq.s32.totalorder %s416_s3, 0 }
  0x21   : > { %s3547_s27 = sand.u32 (!%p546_p10), 1, %s2784_s19   ;;  %s2309_s23 = sshll.u32 (!%p546_p10), %s2796_s22, 1 }
  0x22   : > { %s2963_s28 = scalar_select %p417_p11, %s2788_s20, %s419_s15  }
  0x23   : > { %549 = sbr.rel (%p546_p10) target bundleno = 1694 (0x69e), region = 80  ;;  %s2308_s18 = sshll.u32 (!%p546_p10), %s3547_s27, 5 }
  0x24   : > { %3581 = sst [smem:[#allocation17_spill]] %s2963_s28  ;;  %p634_p12 = scmp.lt.s32.totalorder (!%p546_p10), %s2309_s23, 3 }
  0x25   : > { %p640_p13 = scmp.lt.s32.totalorder (!%p546_p10), %s2792_s21, 1  ;;  %s3582_s0 = sld [smem:[#allocation18_spill]] (!%p546_p10) }
  0x26   : > { %s3583_s5 = sld [smem:[#allocation23_spill]] (!%p546_p10)  ;;  %s3584_s6 = sld [smem:[#allocation24_spill]] (!%p546_p10) }
  0x27   : > { %p2321_p0 = scmp.ne.s32.totalorder (!%p546_p10), %s2792_s21, 0 }
  0x2a   : > { %s3615_s23 = smov (!%p634_p12, %s2309_s23), 3  ;;  %vm688_vm0 = vcmask (!%p2321_p0), 523264  }
  0x2b   : > { %s2971_s29 = scalar_select %p640_p13, %s2792_s21, 1 }
  0x2c   : > { %s2370_s3 = sshll.u32 %s3615_s23, 4 }
  0x2d   : > { %s638_s26 = scalar_lea.vmem %s3582_s0, %s2370_s3  ;;  %s2371_s27 = sshll.u32 %s2971_s29, 4 }
  0x2e   : > { %s2980_s20 = scalar_lea.vmem %s3583_s5, %s2371_s27  ;;  %s2985_s16 = scalar_lea.vmem %s3584_s6, %s2371_s27  ;;  %v684_v0 = vld [vmem:[%s638_s26] sm:$0xff] (!%p2321_p0)  ;;  %v685_v1 = vld [vmem:[%s638_s26 + $0x8] sm:$0xff] (!%p2321_p0)  ;;  %v686_v2 = vld [vmem:[%s638_s26 + $0x10] sm:$0xff] (!%p2321_p0) }
  0x2f   : > { %s2373_s3 = sshll.u32 %s2971_s29, 7  ;;  %s2318_s30 = sshll.u32 %s2971_s29, 1  ;;  %689 = vst.msk [vmem:[#allocation2] sm:$0xff] (!%p2321_p0), %vm688_vm0, %v684_v0  ;;  %690 = vst.msk [vmem:[#allocation2 + $0x8] sm:$0xff] (!%p2321_p0), %vm688_vm0, %v685_v1  ;;  %v687_v3 = vld [vmem:[%s638_s26 + $0x18] sm:$0xff] (!%p2321_p0) }
  0x30   : > { %s3000_s24 = scalar_lea.vmem %s3534_s9, %s2373_s3  ;;  %s3005_s25 = scalar_lea.vmem %s3535_s10, %s2318_s30  ;;  %691 = vst.msk [vmem:[#allocation2 + $0x10] sm:$0xff] (!%p2321_p0), %vm688_vm0, %v686_v2  ;;  %692 = vst.msk [vmem:[#allocation2 + $0x18] sm:$0xff] (!%p2321_p0), %vm688_vm0, %v687_v3 }
  0x31   : > { %s2374_s17 = sshll.u32 %s2971_s29, 8  ;;  %s672_s22 = scalar_lea.vmem %s3537_s12, %s2971_s29 }
  0x32   : > { %s3015_s23 = scalar_lea.vmem %s3536_s11, %s2374_s17  ;;  %s675_s0 = scalar_lea.vmem %s3538_s13, %s2971_s29 }
  0x33   : > { %s678_s5 = scalar_lea.vmem %s3539_s14, %s2971_s29  ;;  %s3025_s30 = scalar_lea.vmem [#allocation3], %s2308_s18 }
  0x34   : > { %683 = sbr.rel (%p2321_p0) target bundleno = 59 (0x3b), region = 84 }
  0x3b PF: > { %v3028_v4 = vld [vmem:[#allocation2] sm:$0xff]  ;;  %v3030_v5 = vld [vmem:[#allocation2 + $0x8] sm:$0xff]  ;;  %s3585_s18 = sld [smem:[#allocation19_spill]]  ;;  %vm701_vm1 = vcmask 130048   ;;  %v3038_v8 = vld [vmem:[#allocation2 + $0x10] sm:$0xff]  ;;  %s3587_s4 = sld [smem:[#allocation20_spill]] }
  0x3c   : > { %v2508_v7 = vpack.c.bf16 %v3030_v5, %v3028_v4  ;;  %v3040_v9 = vld [vmem:[#allocation2 + $0x18] sm:$0xff]  ;;  %s3588_s1 = sld [smem:[#allocation22_spill]]  ;;  %v1031_v24 = vld [vmem:[%s2980_s20 + $0x8] sm:$0xff]  ;;  %v1030_v26 = vld [vmem:[%s2980_s20] sm:$0xff]  ;;  %s3589_s28 = sld [smem:[#allocation21_spill]]  ;;  %vm1396_vm2 = vcmask 523264  }
  0x3d   : > { %v2512_v10 = vpack.c.bf16 %v3040_v9, %v3038_v8  ;;  %v1033_v25 = vld [vmem:[%s2985_s16 + $0x8] sm:$0xff]  ;;  %v1032_v27 = vld [vmem:[%s2985_s16] sm:$0xff]  ;;  %s3590_s26 = scalar_lea.vmem %s3532_s7, %s2971_s29  ;;  %s3591_s19 = scalar_lea.vmem %s3533_s8, %s2971_s29 }
  0x3e   : > { %2509 = vmatprep.subr.bf16.mxu0 %v2508_v7  ;;  %s3592_s20 = sld [smem:[#allocation9_spill]]  ;;  %s2811_s3 = smov [#allocation3]  }
  0x3f   : > { %2511 = vmatpush3.bf16.msra.mxu0 %v2508_v7  ;;  %s3593_s29 = sld [smem:[#allocation7_spill]]  ;;  %s2718_s6 = sshll.u32 %s2811_s3, 4  ;;  %s2719_s6 = int_to_ptr.vmem [resolvable:$false] %s2718_s6 }
  0x40   : > { %2513 = vmatprep.subr.bf16.mxu0 %v2512_v10 }
  0x41   : > { %s3586_s15 = smov %s3585_s18  ;;  %v697_v6 = vld [vmem:[%s3585_s18] sm:$0xff]  ;;  %v865_v15 = vld [vmem:[%s3587_s4 + $0x8] sm:$0xff]  ;;  %v866_v16 = vld [vmem:[%s3587_s4 + $0x10] sm:$0xff] }
  0x42   : > { %2456 = vmatprep.mubr.msk.f32.mxu0 %vm701_vm1, %v697_v6  ;;  %v698_v11 = vld [vmem:[%s3586_s15 + $0x8] sm:$0xff]  ;;  %v699_v12 = vld [vmem:[%s3586_s15 + $0x10] sm:$0xff]  ;;  %v700_v13 = vld [vmem:[%s3586_s15 + $0x18] sm:$0xff] }
  0x43   : > { %2457 = vmatmul.mubr.msk.f32.vlgmr.msra.gmra.mrb[0].mxu0 %vm701_vm1, %v698_v11  ;;  %v864_v14 = vld [vmem:[%s3587_s4] sm:$0xff]  ;;  %v867_v17 = vld [vmem:[%s3587_s4 + $0x18] sm:$0xff]  ;;  %v1064_v19 = vld [vmem:[%s3588_s1 + $0x10] sm:$0xff] }
  0x44   : > { %2515 = vmatpush3.bf16.msra.mxu0 %v2512_v10  ;;  %2463 = vmatprep.mubr.msk.f32.mxu0 %vm701_vm1, %v699_v12  ;;  %v1062_v18 = vld [vmem:[%s3588_s1] sm:$0xff]  ;;  %v1063_v58 = vld [vmem:[%s3588_s1 + $0x8] sm:$0xff]  ;;  %v1065_v62 = vld [vmem:[%s3588_s1 + $0x18] sm:$0xff] }
  0x45   : > { %2517 = vmatprep.subr.bf16.mxu0 %v2508_v7  ;;  %2491 = vmatprep.mubr.msk.f32.mxu1 %vm701_vm1, %v1064_v19  ;;  %v1058_v61 = vld [vmem:[%s3589_s28] sm:$0xff]  ;;  %v1060_v63 = vld [vmem:[%s3589_s28 + $0x10] sm:$0xff]  ;;  %v1059_v0 = vld [vmem:[%s3589_s28 + $0x8] sm:$0xff] }
  0x46   : > { %v1061_v1 = vld [vmem:[%s3589_s28 + $0x18] sm:$0xff] }
  0x47   : > { %2464 = vmatmul.mubr.msk.f32.vlgmr.msra.gmra.mrb[2].mxu0 %vm701_vm1, %v700_v13 }
  0x48   : > { %2519 = vmatpush3.bf16.msra.mxu0 %v2508_v7  ;;  %2470 = vmatprep.mubr.msk.f32.mxu0 %vm701_vm1, %v864_v14 }
  0x49   : > { %2521 = vmatprep.subr.bf16.mxu0 %v2512_v10 }
  0x4b   : > { %2471 = vmatmul.mubr.msk.f32.vlgmr.msra.gmra.mrb[4].mxu0 %vm701_vm1, %v865_v15 }
  0x4c   : > { %2523 = vmatpush3.bf16.msra.mxu0 %v2512_v10  ;;  %2477 = vmatprep.mubr.msk.f32.mxu0 %vm701_vm1, %v866_v16 }
  0x4f   : > { %2478 = vmatmul.mubr.msk.f32.vlgmr.msra.gmra.mrb[6].mxu0 %vm701_vm1, %v867_v17 }
  0x50   : > { %2484 = vmatprep.mubr.msk.f32.mxu0 %vm701_vm1, %v1062_v18 }
 0x116   : > { %v2458_v20 = vpop.f32.mrb[0].mxu0 }
 0x117   : > { %v774_v21 = vpop.f32.mrb[1].mxu0  ;;  %v1035_v29 = vmul.f32 %v2458_v20, %v1031_v24  ;;  %v1047_v30 = vmul.f32 %v2458_v20, %v1033_v25 }
 0x118   : > { %v1034_v34 = vmul.f32 %v1030_v26, %v774_v21  ;;  %v1046_v35 = vmul.f32 %v1032_v27, %v774_v21 }
 0x11a   : > { %v2465_v22 = vpop.f32.mrb[2].mxu0 }
 0x11b   : > { %v855_v23 = vpop.f32.mrb[3].mxu0  ;;  %v1037_v40 = vmul.f32 %v2465_v22, %v1031_v24  ;;  %v1049_v41 = vmul.f32 %v2465_v22, %v1033_v25 }
 0x11c   : > { %v1036_v45 = vmul.f32 %v1030_v26, %v855_v23  ;;  %v1048_v46 = vmul.f32 %v1032_v27, %v855_v23 }
 0x11e   : > { %v2472_v28 = vpop.f32.mrb[4].mxu0 }
 0x11f   : > { %v1039_v31 = vmul.f32 %v2472_v28, %v1033_v25  ;;  %v1051_v32 = vmul.f32 %v2472_v28, %v1031_v24  ;;  %v940_v33 = vpop.f32.mrb[5].mxu0 }
 0x120   : > { %v1038_v36 = vmul.f32 %v1032_v27, %v940_v33  ;;  %v1050_v37 = vmul.f32 %v1030_v26, %v940_v33 }
 0x121   : > { %v1043_v38 = vsub.f32 %v1035_v29, %v1039_v31  ;;  %v1055_v39 = vadd.f32 %v1051_v32, %v1047_v30 }
 0x122   : > { %v1042_v42 = vsub.f32 %v1034_v34, %v1038_v36  ;;  %v1054_v43 = vadd.f32 %v1050_v37, %v1046_v35  ;;  %v2479_v44 = vpop.f32.mrb[6].mxu0  ;;  %v1471_v34 = vld [vmem:[%s3000_s24 + $0x8] sm:$0xff]  ;;  %v1473_v35 = vld [vmem:[%s3000_s24 + $0x18] sm:$0xff]  ;;  %v1470_v37 = vld [vmem:[%s3000_s24] sm:$0xff] }
 0x123   : > { %v1041_v47 = vmul.f32 %v2479_v44, %v1033_v25  ;;  %v1053_v48 = vmul.f32 %v2479_v44, %v1031_v24  ;;  %v1021_v49 = vpop.f32.mrb[7].mxu0  ;;  %v2540_v36 = vpack.c.bf16 %v1473_v35, %v1471_v34  ;;  %v1476_v44 = vld [vmem:[%s3000_s24 + $0x30] sm:$0xff]  ;;  %v1898_v35 = vld [vmem:[%s3015_s23 + $0x18] sm:$0xff] }
 0x124   : > { %v1040_v50 = vmul.f32 %v1032_v27, %v1021_v49  ;;  %v1052_v51 = vmul.f32 %v1030_v26, %v1021_v49  ;;  %v2524_v52 = vpack.c.bf16 %v1055_v39, %v1054_v43  ;;  %v2532_v53 = vpack.c.bf16 %v1043_v38, %v1042_v42  ;;  %v1472_v38 = vld [vmem:[%s3000_s24 + $0x10] sm:$0xff]  ;;  %v1474_v43 = vld [vmem:[%s3000_s24 + $0x20] sm:$0xff] }
 0x125   : > { %v1045_v54 = vsub.f32 %v1037_v40, %v1041_v47  ;;  %v1057_v55 = vadd.f32 %v1053_v48, %v1049_v41  ;;  %v2542_v39 = vpack.c.bf16 %v1472_v38, %v1470_v37  ;;  %v1475_v40 = vld [vmem:[%s3000_s24 + $0x28] sm:$0xff]  ;;  %v1477_v41 = vld [vmem:[%s3000_s24 + $0x38] sm:$0xff]  ;;  %v1478_v49 = vld [vmem:[%s3000_s24 + $0x40] sm:$0xff] }
 0x126   : > { %v1044_v56 = vsub.f32 %v1036_v45, %v1040_v50  ;;  %2525 = vmatprep.subr.bf16.mxu0 %v2524_v52  ;;  %v1056_v57 = vadd.f32 %v1052_v51, %v1048_v46  ;;  %v2544_v42 = vpack.c.bf16 %v1477_v41, %v1475_v40  ;;  %v2546_v45 = vpack.c.bf16 %v1476_v44, %v1474_v43  ;;  %v1479_v46 = vld [vmem:[%s3000_s24 + $0x48] sm:$0xff]  ;;  %v1481_v47 = vld [vmem:[%s3000_s24 + $0x58] sm:$0xff]  ;;  %v1480_v50 = vld [vmem:[%s3000_s24 + $0x50] sm:$0xff] }
 0x127   : > { %2527 = vmatpush3.bf16.msra.mxu0 %v2524_v52  ;;  %v2548_v48 = vpack.c.bf16 %v1481_v47, %v1479_v46  ;;  %v2550_v51 = vpack.c.bf16 %v1480_v50, %v1478_v49  ;;  %v1483_v52 = vld [vmem:[%s3000_s24 + $0x68] sm:$0xff]  ;;  %v1897_v34 = vld [vmem:[%s3015_s23 + $0x10] sm:$0xff]  ;;  %v1915_v37 = vld [vmem:[%s3015_s23 + $0xa0] sm:$0xff] }
 0x128   : > { %2533 = vmatprep.subr.bf16.mxu0 %v2532_v53  ;;  %v2528_v59 = vpack.c.bf16 %v1057_v55, %v1056_v57  ;;  %v2536_v60 = vpack.c.bf16 %v1045_v54, %v1044_v56  ;;  %v1482_v54 = vld [vmem:[%s3000_s24 + $0x60] sm:$0xff]  ;;  %v1484_v56 = vld [vmem:[%s3000_s24 + $0x70] sm:$0xff]  ;;  %v2810_v57 = vmov 0.0   ;;  %v1916_v38 = vld [vmem:[%s3015_s23 + $0xa8] sm:$0xff] }
 0x129   : > { %v1899_v40 = vld [vmem:[%s3015_s23 + $0x20] sm:$0xff]  ;;  %v1900_v41 = vld [vmem:[%s3015_s23 + $0x28] sm:$0xff]  ;;  %v1917_v43 = vld [vmem:[%s3015_s23 + $0xb0] sm:$0xff] }
 0x12a   : > { %2485 = vmatmul.mubr.msk.f32.vlgmr.msra.gmra.mrb[8].mxu0 %vm701_vm1, %v1063_v58  ;;  %2529 = vmatprep.subr.bf16.mxu1 %v2528_v59  ;;  %v2554_v58 = vpack.c.bf16 %v1484_v56, %v1482_v54  ;;  %v1918_v44 = vld [vmem:[%s3015_s23 + $0xb8] sm:$0xff]  ;;  %v1901_v46 = vld [vmem:[%s3015_s23 + $0x30] sm:$0xff]  ;;  %v1919_v49 = vld [vmem:[%s3015_s23 + $0xc0] sm:$0xff] }
 0x12b   : > { %2531 = vmatpush3.bf16.msra.mxu1 %v2528_v59  ;;  %2535 = vmatpush3.bf16.msra.mxu0 %v2532_v53  ;;  %v1485_v53 = vld [vmem:[%s3000_s24 + $0x78] sm:$0xff]  ;;  %v1920_v50 = vld [vmem:[%s3015_s23 + $0xc8] sm:$0xff] }
 0x12c   : > { %2537 = vmatprep.subr.bf16.mxu1 %v2536_v60  ;;  %2498 = vmatprep.mubr.msk.f32.mxu0 %vm701_vm1, %v1058_v61  ;;  %v2552_v55 = vpack.c.bf16 %v1485_v53, %v1483_v52  ;;  %v1902_v47 = vld [vmem:[%s3015_s23 + $0x38] sm:$0xff]  ;;  %v1903_v52 = vld [vmem:[%s3015_s23 + $0x40] sm:$0xff]  ;;  %v1904_v53 = vld [vmem:[%s3015_s23 + $0x48] sm:$0xff] }
 0x12d   : > { %2541 = vmatprep.subr.bf16.mxu0 %v2540_v36  ;;  %v2562_v36 = vpack.c.bf16 %v1898_v35, %v1897_v34  ;;  %v2574_v54 = vpack.c.bf16 %v1904_v53, %v1903_v52  ;;  %v1922_v56 = vld [vmem:[%s3015_s23 + $0xd8] sm:$0xff] }
 0x12e   : > { %2492 = vmatmul.mubr.msk.f32.vlgmr.msra.gmra.mrb[0].mxu1 %vm701_vm1, %v1065_v62 }
 0x12f   : > { %2539 = vmatpush3.bf16.msra.mxu1 %v2536_v60  ;;  %2505 = vmatprep.mubr.msk.f32.mxu1 %vm701_vm1, %v1060_v63 }
 0x132   : > { %2499 = vmatmul.mubr.msk.f32.vlgmr.msra.gmra.mrb[8].mxu0 %vm701_vm1, %v1059_v0 }
 0x133   : > { %2543 = vmatpush1.bf16.msra.mxu0 %v2542_v39  ;;  %1574 = vmatprep.mubr.f32.mxu0 %v2810_v57  ;;  %v2564_v39 = vpack.c.bf16 %v1916_v38, %v1915_v37 }
 0x134   : > { %2545 = vmatprep.subr.bf16.mxu0 %v2544_v42  ;;  %v2566_v42 = vpack.c.bf16 %v1900_v41, %v1899_v40 }
 0x136   : > { %2506 = vmatmul.mubr.msk.f32.vlgmr.msra.gmra.mrb[0].mxu1 %vm701_vm1, %v1061_v1 }
 0x137   : > { %2547 = vmatpush1.bf16.msra.mxu0 %v2546_v45  ;;  %v2568_v45 = vpack.c.bf16 %v1918_v44, %v1917_v43 }
 0x138   : > { %2549 = vmatprep.subr.bf16.mxu0 %v2548_v48  ;;  %v2570_v48 = vpack.c.bf16 %v1902_v47, %v1901_v46 }
 0x13b   : > { %2551 = vmatpush1.bf16.msra.mxu0 %v2550_v51  ;;  %v2572_v51 = vpack.c.bf16 %v1920_v50, %v1919_v49 }
 0x13c   : > { %2553 = vmatprep.subr.bf16.mxu0 %v2552_v55  ;;  %v1921_v55 = vld [vmem:[%s3015_s23 + $0xd0] sm:$0xff] }
 0x13f   : > { %2555 = vmatpush1.bf16.msra.mxu0 %v2554_v58  ;;  %v1905_v58 = vld [vmem:[%s3015_s23 + $0x50] sm:$0xff] }
 0x205   : > { %v2500_v2 = vpop.f32.mrb[8].mxu0 }
 0x206   : > { %v1300_v3 = vpop.f32.mrb[9].mxu0  ;;  %v1391_v7 = vadd.f32 %v2500_v2, %v3030_v5 }
 0x207   : > { %v1390_v6 = vadd.f32 %v1300_v3, %v3028_v4 }
 0x208   : > { %v1400_v15 = vsel %vm1396_vm2, %v1391_v7, 0.0 }
 0x209   : > { %v2507_v10 = vpop.f32.mrb[0].mxu1  ;;  %v1397_v11 = vsel %vm1396_vm2, %v1390_v6, 0.0 }
 0x20a   : > { %1398 = vadd.xlane.f32.xlu0 %v1397_v11  ;;  %v1381_v12 = vpop.f32.mrb[1].mxu1  ;;  %v1393_v14 = vadd.f32 %v2507_v10, %v3040_v9 }
 0x20b   : > { %v1392_v13 = vadd.f32 %v1381_v12, %v3038_v8  ;;  %v2338_v12 = vld [vmem:[%s3590_s26] ss:$0 sm:$0xff]  ;;  %s2122_s26 = sshll.u32 %s3025_s30, 4  ;;  %s3466_s26 = int_to_ptr.vmem [resolvable:$true] %s2122_s26 }
 0x20c   : > { %v1406_v17 = vsel %vm1396_vm2, %v1393_v14, 0.0  ;;  %p2721_p5 = scmp.lt.s32.totalorder %s3466_s26, %s2719_s6 }
 0x20d   : > { %v1403_v16 = vsel %vm1396_vm2, %v1392_v13, 0.0 }
 0x20e   : > { %1401 = vadd.xlane.f32.xlu0 %v1400_v15  ;;  %1404 = vadd.xlane.f32.xlu1 %v1403_v16 }
 0x212   : > { %1407 = vadd.xlane.f32.xlu1 %v1406_v17 }
 0x297   : > { %v1399_v4 = vpop.xlane.xlu0 %1398 }
 0x298   : > { %v1410_v5 = vmul.f32 0.015625, %v1399_v4 }
 0x29a   : > { %v3116_v18 = vsub.f32 %v1390_v6, %v1410_v5 }
 0x29b   : > { %v1402_v19 = vpop.xlane.xlu0 %1401  ;;  %v1405_v20 = vpop.xlane.xlu1 %1404 }
 0x29c   : > { %v1411_v21 = vmul.f32 0.015625, %v1402_v19  ;;  %v1412_v22 = vmul.f32 0.015625, %v1405_v20  ;;  %v1418_v8 = vmul.f32 %v3116_v18, %v3116_v18 }
 0x29e   : > { %v3120_v9 = vsub.f32 %v1391_v7, %v1411_v21  ;;  %v3122_v23 = vsub.f32 %v1392_v13, %v1412_v22  ;;  %v1422_v24 = vsel %vm1396_vm2, %v1418_v8, 0.0 }
 0x29f   : > { %1423 = vadd.xlane.f32.xlu0 %v1422_v24  ;;  %v1408_v25 = vpop.xlane.xlu1 %1407 }
 0x2a0   : > { %v1413_v26 = vmul.f32 0.015625, %v1408_v25  ;;  %v1419_v27 = vmul.f32 %v3120_v9, %v3120_v9  ;;  %v1420_v28 = vmul.f32 %v3122_v23, %v3122_v23  ;;  %v1911_v25 = vld [vmem:[%s3015_s23 + $0x80] sm:$0xff] }
 0x2a2   : > { %v3129_v29 = vsub.f32 %v1393_v14, %v1413_v26  ;;  %v1425_v30 = vsel %vm1396_vm2, %v1419_v27, 0.0  ;;  %v1428_v31 = vsel %vm1396_vm2, %v1420_v28, 0.0  ;;  %v2339_v14 = vld [vmem:[%s3591_s19] ss:$0 sm:$0xff]  ;;  %v1912_v26 = vld [vmem:[%s3015_s23 + $0x88] sm:$0xff]  ;;  %s3595_s19 = sld [smem:[#allocation25_spill]] }
 0x2a3   : > { %1426 = vadd.xlane.f32.xlu1 %v1425_v30  ;;  %1429 = vadd.xlane.f32.xlu0 %v1428_v31  ;;  %v2556_v27 = vpack.c.bf16 %v1912_v26, %v1911_v25  ;;  %v1895_v28 = vld [vmem:[%s3015_s23] sm:$0xff]  ;;  %v1913_v31 = vld [vmem:[%s3015_s23 + $0x90] sm:$0xff] }
 0x2a4   : > { %v1421_v32 = vmul.f32 %v3129_v29, %v3129_v29 }
 0x2a5   : > { %2557 = vmatprep.subr.bf16.mxu1 %v2556_v27 }
 0x2a6   : > { %v1431_v33 = vsel %vm1396_vm2, %v1421_v32, 0.0  ;;  %v1914_v32 = vld [vmem:[%s3015_s23 + $0x98] sm:$0xff] }
 0x2a7   : > { %1432 = vadd.xlane.f32.xlu1 %v1431_v33  ;;  %v2560_v33 = vpack.c.bf16 %v1914_v32, %v1913_v31 }
 0x2a8   : > { %s3596_s2 = smov %s3595_s19 }
 0x32c   : > { %v1424_v59 = vpop.xlane.xlu0 %1423 }
 0x32d   : > { %v1434_v60 = vmul.f32 0.015625, %v1424_v59  ;;  %v1906_v59 = vld [vmem:[%s3015_s23 + $0x58] sm:$0xff] }
 0x32f   : > { %v1438_v61 = vadd.f32 1e-12, %v1434_v60  ;;  %v2578_v60 = vpack.c.bf16 %v1906_v59, %v1905_v58 }
 0x330   : > { %v1430_v62 = vpop.xlane.xlu0 %1429  ;;  %v1427_v63 = vpop.xlane.xlu1 %1426 }
 0x331   : > { %2666 = vrsqrt.f32 %v1438_v61  ;;  %v1436_v0 = vmul.f32 0.015625, %v1430_v62  ;;  %v1435_v1 = vmul.f32 0.015625, %v1427_v63  ;;  %v1923_v61 = vld [vmem:[%s3015_s23 + $0xe0] sm:$0xff]  ;;  %v1924_v62 = vld [vmem:[%s3015_s23 + $0xe8] sm:$0xff] }
 0x332   : > { %v2580_v63 = vpack.c.bf16 %v1924_v62, %v1923_v61 }
 0x333   : > { %v1440_v2 = vadd.f32 1e-12, %v1436_v0  ;;  %v1439_v3 = vadd.f32 1e-12, %v1435_v1  ;;  %v1907_v0 = vld [vmem:[%s3015_s23 + $0x60] sm:$0xff]  ;;  %v1908_v1 = vld [vmem:[%s3015_s23 + $0x68] sm:$0xff] }
 0x334   : > { %v1433_v6 = vpop.xlane.xlu1 %1432 }
 0x335   : > { %2668 = vrsqrt.f32 %v1440_v2  ;;  %v1437_v7 = vmul.f32 0.015625, %v1433_v6  ;;  %v2582_v2 = vpack.c.bf16 %v1908_v1, %v1907_v0  ;;  %v1926_v6 = vld [vmem:[%s3015_s23 + $0xf8] sm:$0xff] }
 0x336   : > { %2670 = vrsqrt.f32 %v1439_v3  ;;  %v1925_v3 = vld [vmem:[%s3015_s23 + $0xf0] sm:$0xff] }
 0x337   : > { %v1441_v10 = vadd.f32 1e-12, %v1437_v7  ;;  %v1909_v7 = vld [vmem:[%s3015_s23 + $0x70] sm:$0xff] }
 0x339   : > { %2672 = vrsqrt.f32 %v1441_v10  ;;  %v2584_v10 = vpack.c.bf16 %v1926_v6, %v1925_v3 }
 0x33b   : > { %v2667_v11 = vpop.eup %2666 }
 0x33c   : > { %v1446_v13 = vmul.f32 %v2667_v11, %v3116_v18  ;;  %v1910_v11 = vld [vmem:[%s3015_s23 + $0x78] sm:$0xff] }
 0x33e   : > { %v1456_v15 = vmul.f32 %v2338_v12, %v1446_v13  ;;  %v1488_v13 = vlaneseq }
 0x33f   : > { %v2669_v16 = vpop.eup %2668 }
 0x340   : > { %v2671_v17 = vpop.eup %2670  ;;  %v3163_v4 = vadd.f32 %v2339_v14, %v1456_v15  ;;  %v1448_v19 = vmul.f32 %v2669_v16, %v3122_v23  ;;  %v1486_v16 = vld [vmem:[%s3005_s25] sm:$0x3] }
 0x341   : > { %v1447_v5 = vmul.f32 %v2671_v17, %v3120_v9 }
 0x342   : > { %2340 = vmatmul.mubr.msk.f32.vlgmr.msra.gmra.mrb[10].mxu0 %vm1396_vm2, %v3163_v4  ;;  %v1458_v22 = vmul.f32 %v2338_v12, %v1448_v19 }
 0x343   : > { %v2673_v18 = vpop.eup %2672  ;;  %1580 = vmatprep.mubr.f32.mxu0 %v2810_v57  ;;  %v1457_v20 = vmul.f32 %v2338_v12, %v1447_v5 }
 0x344   : > { %v1449_v8 = vmul.f32 %v2673_v18, %v3129_v29  ;;  %v3174_v9 = vadd.f32 %v2339_v14, %v1458_v22  ;;  %v1896_v29 = vld [vmem:[%s3015_s23 + $0x8] sm:$0xff] }
 0x345   : > { %v3169_v21 = vadd.f32 %v2339_v14, %v1457_v20  ;;  %v2558_v30 = vpack.c.bf16 %v1896_v29, %v1895_v28 }
 0x346   : > { %v1459_v23 = vmul.f32 %v2338_v12, %v1449_v8  ;;  %v2586_v12 = vpack.c.bf16 %v1910_v11, %v1909_v7 }
 0x347   : > { %2341 = vmatmul.mubr.msk.f32.gmra.mrb[12].mxu0 %vm1396_vm2, %v3169_v21  ;;  %2559 = vmatpush3.bf16.msra.mxu1 %v2558_v30 }
 0x348   : > { %1586 = vmatprep.mubr.f32.mxu0 %v2810_v57  ;;  %v3178_v24 = vadd.f32 %v2339_v14, %v1459_v23  ;;  %2561 = vmatprep.subr.bf16.mxu1 %v2560_v33  ;;  %v1489_v14 = vshrl.u32 %v1488_v13, 7 }
 0x34a   : > { %v1490_v15 = vsub.s32 0, %v1489_v14  ;;  %v1494_v17 = vsub.s32 1, %v1489_v14 }
 0x34b   : > { %2342 = vmatmul.mubr.msk.f32.gmra.mrb[14].mxu0 %vm1396_vm2, %v3174_v9  ;;  %2563 = vmatpush3.bf16.msra.mxu1 %v2562_v36 }
 0x34c   : > { %1592 = vmatprep.mubr.f32.mxu0 %v2810_v57  ;;  %2565 = vmatprep.subr.bf16.mxu1 %v2564_v39  ;;  %v2576_v57 = vpack.c.bf16 %v1922_v56, %v1921_v55  ;;  %v1491_v5 = vrot.slane %v1486_v16, %v1490_v15  ;;  %v1495_v19 = vrot.slane %v1486_v16, %v1494_v17 }
 0x34f   : > { %2343 = vmatmul.mubr.msk.f32.gmra.mrb[16].mxu0 %vm1396_vm2, %v3178_v24  ;;  %2567 = vmatpush3.bf16.msra.mxu1 %v2566_v42 }
 0x350   : > { %2569 = vmatprep.subr.bf16.mxu1 %v2568_v45 }
 0x353   : > { %2571 = vmatpush3.bf16.msra.mxu1 %v2570_v48 }
 0x354   : > { %2573 = vmatprep.subr.bf16.mxu1 %v2572_v51 }
 0x357   : > { %2575 = vmatpush3.bf16.msra.mxu1 %v2574_v54 }
 0x358   : > { %2577 = vmatprep.subr.bf16.mxu1 %v2576_v57 }
 0x35b   : > { %2579 = vmatpush3.bf16.msra.mxu1 %v2578_v60 }
 0x35c   : > { %2581 = vmatprep.subr.bf16.mxu1 %v2580_v63 }
 0x35f   : > { %2583 = vmatpush3.bf16.msra.mxu1 %v2582_v2 }
 0x360   : > { %2585 = vmatprep.subr.bf16.mxu1 %v2584_v10 }
 0x363   : > { %2587 = vmatpush3.bf16.msra.mxu1 %v2586_v12 }
 0x415   : > { %v1576_v18 = vpop.f32.mrb[10].mxu0 }
 0x416   : > { %v3215_v20 = vadd.f32 %v1576_v18, %v1491_v5  ;;  %v1578_v22 = vpop.f32.mrb[11].mxu0 }
 0x417   : > { %v3217_v8 = vadd.f32 %v1578_v22, %v1495_v19 }
 0x418   : > { %v3220_v23 = vmul.f32 0.70710677, %v3215_v20 }
 0x419   : > { %v3223_v25 = vmul.f32 0.70710677, %v3217_v8 }
 0x41a   : > { %v3226_v26 = vand.u32 2147483647, %v3220_v23  ;;  %v1582_v27 = vpop.f32.mrb[12].mxu0  ;;  %vm1847_vm3 = vcmp.ge.f32.partialorder %v3220_v23, 0.0 }
 0x41b   : > { %v3229_v28 = vand.u32 2147483647, %v3223_v25  ;;  %v3231_v29 = vadd.f32 %v1582_v27, %v1491_v5  ;;  %v1584_v30 = vpop.f32.mrb[13].mxu0  ;;  %vm1848_vm4 = vcmp.ge.f32.partialorder %v3223_v25, 0.0 }
 0x41c   : > { %v1623_v31 = vmul.f32 0.5, %v3226_v26  ;;  %v3234_v32 = vadd.f32 %v1584_v30, %v1495_v19  ;;  %v1655_v6 = vsub.f32 0.0, %v3226_v26 }
 0x41d   : > { %v1624_v33 = vmul.f32 0.5, %v3229_v28  ;;  %v3238_v34 = vmul.f32 0.70710677, %v3231_v29  ;;  %v1656_v11 = vsub.f32 0.0, %v3229_v28 }
 0x41e   : > { %v1631_v35 = vadd.f32 1.0, %v1623_v31  ;;  %v3241_v36 = vmul.f32 0.70710677, %v3234_v32  ;;  %v1588_v37 = vpop.f32.mrb[14].mxu0  ;;  %v1663_v27 = vmul.f32 %v1655_v6, %v3226_v26 }
 0x41f   : > { %v1632_v38 = vadd.f32 1.0, %v1624_v33  ;;  %v1617_v39 = vand.u32 2147483647, %v3238_v34  ;;  %v1590_v40 = vpop.f32.mrb[15].mxu0  ;;  %v3245_v44 = vadd.f32 %v1588_v37, %v1491_v5  ;;  %v1664_v33 = vmul.f32 %v1656_v11, %v3229_v28 }
 0x420   : > { %2674 = vrcp.f32 %v1631_v35  ;;  %v1618_v41 = vand.u32 2147483647, %v3241_v36  ;;  %v3247_v45 = vadd.f32 %v1590_v40, %v1495_v19  ;;  %vm1849_vm5 = vcmp.ge.f32.partialorder %v3238_v34, 0.0 }
 0x421   : > { %2676 = vrcp.f32 %v1632_v38  ;;  %v1625_v42 = vmul.f32 0.5, %v1617_v39  ;;  %v3252_v51 = vmul.f32 0.70710677, %v3245_v44  ;;  %v1657_v16 = vsub.f32 0.0, %v1617_v39 }
 0x422   : > { %v1626_v43 = vmul.f32 0.5, %v1618_v41  ;;  %v1594_v46 = vpop.f32.mrb[16].mxu0  ;;  %v3255_v52 = vmul.f32 0.70710677, %v3247_v45  ;;  %v1658_v18 = vsub.f32 0.0, %v1618_v41  ;;  %vm1850_vm6 = vcmp.ge.f32.partialorder %v3241_v36, 0.0 }
 0x423   : > { %v1633_v47 = vadd.f32 1.0, %v1625_v42  ;;  %v3249_v48 = vadd.f32 %v1594_v46, %v1491_v5  ;;  %v1596_v49 = vpop.f32.mrb[17].mxu0  ;;  %v3258_v53 = vand.u32 2147483647, %v3252_v51  ;;  %v1665_v42 = vmul.f32 %v1657_v16, %v1617_v39 }
 0x424   : > { %v1634_v50 = vadd.f32 1.0, %v1626_v43  ;;  %v3261_v54 = vand.u32 2147483647, %v3255_v52  ;;  %v3267_v57 = vadd.f32 %v1596_v49, %v1495_v19  ;;  %v1666_v49 = vmul.f32 %v1658_v18, %v1618_v41 }
 0x425   : > { %2678 = vrcp.f32 %v1633_v47  ;;  %v3264_v55 = vmul.f32 0.70710677, %v3249_v48  ;;  %v1627_v56 = vmul.f32 0.5, %v3258_v53  ;;  %v3307_v28 = vadd.f32 -1.2655122, %v1664_v33 }
 0x426   : > { %2680 = vrcp.f32 %v1634_v50  ;;  %v1628_v58 = vmul.f32 0.5, %v3261_v54  ;;  %v3276_v62 = vmul.f32 0.70710677, %v3267_v57  ;;  %v3302_v50 = vadd.f32 -1.2655122, %v1663_v27 }
 0x427   : > { %v3271_v59 = vand.u32 2147483647, %v3264_v55  ;;  %v1635_v61 = vadd.f32 1.0, %v1627_v56  ;;  %vm1851_vm7 = vcmp.ge.f32.partialorder %v3252_v51, 0.0  ;;  %vm1852_vm8 = vcmp.ge.f32.partialorder %v3255_v52, 0.0 }
 0x428   : > { %v1636_v1 = vadd.f32 1.0, %v1628_v58  ;;  %v3286_v13 = vand.u32 2147483647, %v3276_v62  ;;  %vm1853_vm9 = vcmp.ge.f32.partialorder %v3264_v55, 0.0  ;;  %v1605_v52 = vmul.f32 0.5, %v3249_v48 }
 0x429   : > { %v1629_v2 = vmul.f32 0.5, %v3271_v59  ;;  %2682 = vrcp.f32 %v1635_v61  ;;  %vm1854_vm10 = vcmp.ge.f32.partialorder %v3276_v62, 0.0  ;;  %v1606_v55 = vmul.f32 0.5, %v3267_v57 }
 0x42a   : > { %v3273_v60 = vpop.eup %2674  ;;  %2684 = vrcp.f32 %v1636_v1  ;;  %v1630_v22 = vmul.f32 0.5, %v3286_v13 }
 0x42b   : > { %v3278_v63 = vpop.eup %2676  ;;  %v1679_v0 = vmul.f32 0.17087276, %v3273_v60  ;;  %v1637_v10 = vadd.f32 1.0, %v1629_v2  ;;  %v3312_v2 = vadd.f32 -1.2655122, %v1665_v42 }
 0x42c   : > { %v1680_v3 = vmul.f32 0.17087276, %v3278_v63  ;;  %v1638_v38 = vadd.f32 1.0, %v1630_v22 }
 0x42d   : > { %v1687_v7 = vadd.f32 -0.82215226, %v1679_v0  ;;  %2686 = vrcp.f32 %v1637_v10  ;;  %v3317_v10 = vadd.f32 -1.2655122, %v1666_v49 }
 0x42e   : > { %v1688_v12 = vadd.f32 -0.82215226, %v1680_v3  ;;  %2688 = vrcp.f32 %v1638_v38 }
 0x42f   : > { %v3288_v14 = vpop.eup %2678  ;;  %v1695_v15 = vmul.f32 %v3273_v60, %v1687_v7 }
 0x430   : > { %v3291_v17 = vpop.eup %2680  ;;  %v1696_v5 = vmul.f32 %v3278_v63, %v1688_v12  ;;  %v1681_v19 = vmul.f32 0.17087276, %v3288_v14 }
 0x431   : > { %v1703_v30 = vadd.f32 1.4885159, %v1695_v15  ;;  %v1682_v31 = vmul.f32 0.17087276, %v3291_v17 }
 0x432   : > { %v1704_v35 = vadd.f32 1.4885159, %v1696_v5  ;;  %v1689_v37 = vadd.f32 -0.82215226, %v1681_v19  ;;  %v1659_v5 = vsub.f32 0.0, %v3258_v53 }
 0x433   : > { %v1711_v40 = vmul.f32 %v3273_v60, %v1703_v30  ;;  %v1690_v43 = vadd.f32 -0.82215226, %v1682_v31  ;;  %v3305_v58 = vpop.eup %2682 }
 0x434   : > { %v1712_v46 = vmul.f32 %v3278_v63, %v1704_v35  ;;  %v1697_v47 = vmul.f32 %v3288_v14, %v1689_v37  ;;  %v3309_v1 = vpop.eup %2684  ;;  %v1683_v41 = vmul.f32 0.17087276, %v3305_v58 }
 0x435   : > { %v1719_v26 = vadd.f32 -1.135204, %v1711_v40  ;;  %v1698_v56 = vmul.f32 %v3291_v17, %v1690_v43  ;;  %v1684_v11 = vmul.f32 0.17087276, %v3309_v1  ;;  %v1660_v40 = vsub.f32 0.0, %v3261_v54 }
 0x436   : > { %v1720_v61 = vadd.f32 -1.135204, %v1712_v46  ;;  %v1705_v0 = vadd.f32 1.4885159, %v1697_v47  ;;  %v1691_v19 = vadd.f32 -0.82215226, %v1683_v41 }
 0x437   : > { %v1727_v39 = vmul.f32 %v3273_v60, %v1719_v26  ;;  %v1706_v3 = vadd.f32 1.4885159, %v1698_v56  ;;  %v3320_v12 = vpop.eup %2686  ;;  %v1692_v27 = vadd.f32 -0.82215226, %v1684_v11 }
 0x438   : > { %v1728_v6 = vmul.f32 %v3278_v63, %v1720_v61  ;;  %v1713_v7 = vmul.f32 %v3288_v14, %v1705_v0  ;;  %v1699_v33 = vmul.f32 %v3305_v58, %v1691_v19  ;;  %v1685_v35 = vmul.f32 0.17087276, %v3320_v12  ;;  %v3332_v26 = vpop.eup %2688 }
 0x439   : > { %v1735_v15 = vadd.f32 0.27886808, %v1727_v39  ;;  %v1714_v16 = vmul.f32 %v3291_v17, %v1706_v3  ;;  %v1700_v42 = vmul.f32 %v3309_v1, %v1692_v27 }
 0x43a   : > { %v1736_v18 = vadd.f32 0.27886808, %v1728_v6  ;;  %v1721_v22 = vadd.f32 -1.135204, %v1713_v7  ;;  %v1707_v47 = vadd.f32 1.4885159, %v1699_v33  ;;  %v3343_v33 = vmul.f32 %v1659_v5, %v3258_v53 }
 0x43b   : > { %v1743_v30 = vmul.f32 %v3273_v60, %v1735_v15  ;;  %v1722_v31 = vadd.f32 -1.135204, %v1714_v16  ;;  %v1693_v49 = vadd.f32 -0.82215226, %v1685_v35  ;;  %v1708_v0 = vadd.f32 1.4885159, %v1700_v42 }
 0x43c   : > { %v1744_v37 = vmul.f32 %v3278_v63, %v1736_v18  ;;  %v1729_v38 = vmul.f32 %v3288_v14, %v1721_v22  ;;  %v1715_v41 = vmul.f32 %v3305_v58, %v1707_v47  ;;  %v1686_v16 = vmul.f32 0.17087276, %v3332_v26 }
 0x43d   : > { %v1751_v43 = vadd.f32 -0.18628806, %v1743_v30  ;;  %v1730_v46 = vmul.f32 %v3291_v17, %v1722_v31  ;;  %v1701_v6 = vmul.f32 %v3320_v12, %v1693_v49  ;;  %v1716_v15 = vmul.f32 %v3309_v1, %v1708_v0 }
 0x43e   : > { %v1752_v56 = vadd.f32 -0.18628806, %v1744_v37  ;;  %v1737_v61 = vadd.f32 0.27886808, %v1729_v38  ;;  %v1723_v22 = vadd.f32 -1.135204, %v1715_v41 }
 0x43f   : > { %v1759_v39 = vmul.f32 %v3273_v60, %v1751_v43  ;;  %v1738_v3 = vadd.f32 0.27886808, %v1730_v46  ;;  %v1709_v27 = vadd.f32 1.4885159, %v1701_v6  ;;  %v1724_v35 = vadd.f32 -1.135204, %v1716_v15 }
 0x440   : > { %v1760_v7 = vmul.f32 %v3278_v63, %v1752_v56  ;;  %v1745_v11 = vmul.f32 %v3288_v14, %v1737_v61  ;;  %v1731_v42 = vmul.f32 %v3305_v58, %v1723_v22  ;;  %v1694_v56 = vadd.f32 -0.82215226, %v1686_v16 }
 0x441   : > { %v1767_v19 = vadd.f32 0.09678418, %v1759_v39  ;;  %v1746_v18 = vmul.f32 %v3291_v17, %v1738_v3  ;;  %v1717_v43 = vmul.f32 %v3320_v12, %v1709_v27  ;;  %v1732_v49 = vmul.f32 %v3309_v1, %v1724_v35 }
 0x442   : > { %v1768_v30 = vadd.f32 0.09678418, %v1760_v7  ;;  %v1753_v31 = vadd.f32 -0.18628806, %v1745_v11  ;;  %v1739_v53 = vadd.f32 0.27886808, %v1731_v42  ;;  %v1702_v6 = vmul.f32 %v3332_v26, %v1694_v56 }
 0x443   : > { %v1775_v37 = vmul.f32 %v3273_v60, %v1767_v19  ;;  %v1754_v38 = vadd.f32 -0.18628806, %v1746_v18  ;;  %v1725_v5 = vadd.f32 -1.135204, %v1717_v43  ;;  %v1740_v41 = vadd.f32 0.27886808, %v1732_v49 }
 0x444   : > { %v1776_v46 = vmul.f32 %v3278_v63, %v1768_v30  ;;  %v1761_v47 = vmul.f32 %v3288_v14, %v1753_v31  ;;  %v1747_v15 = vmul.f32 %v3305_v58, %v1739_v53  ;;  %v1710_v27 = vadd.f32 1.4885159, %v1702_v6 }
 0x445   : > { %v1783_v61 = vadd.f32 0.37409195, %v1775_v37  ;;  %v1762_v0 = vmul.f32 %v3291_v17, %v1754_v38  ;;  %v1733_v19 = vmul.f32 %v3320_v12, %v1725_v5  ;;  %v1748_v22 = vmul.f32 %v3309_v1, %v1740_v41 }
 0x446   : > { %v1784_v39 = vadd.f32 0.37409195, %v1776_v46  ;;  %v1769_v3 = vadd.f32 0.09678418, %v1761_v47  ;;  %v1755_v35 = vadd.f32 -0.18628806, %v1747_v15  ;;  %v1718_v46 = vmul.f32 %v3332_v26, %v1710_v27 }
 0x447   : > { %v1791_v7 = vmul.f32 %v3273_v60, %v1783_v61  ;;  %v1770_v11 = vadd.f32 0.09678418, %v1762_v0  ;;  %v1741_v37 = vadd.f32 0.27886808, %v1733_v19  ;;  %v1756_v43 = vadd.f32 -0.18628806, %v1748_v22 }
 0x448   : > { %v1792_v18 = vmul.f32 %v3278_v63, %v1784_v39  ;;  %v1777_v16 = vmul.f32 %v3288_v14, %v1769_v3  ;;  %v1763_v56 = vmul.f32 %v3305_v58, %v1755_v35  ;;  %v1726_v39 = vadd.f32 -1.135204, %v1718_v46 }
 0x449   : > { %v1799_v30 = vadd.f32 1.0000237, %v1791_v7  ;;  %v1778_v31 = vmul.f32 %v3291_v17, %v1770_v11  ;;  %v1749_v61 = vmul.f32 %v3320_v12, %v1741_v37  ;;  %v1764_v5 = vmul.f32 %v3309_v1, %v1756_v43 }
 0x44a   : > { %v1800_v38 = vadd.f32 1.0000237, %v1792_v18  ;;  %v1785_v42 = vadd.f32 0.37409195, %v1777_v16  ;;  %v1771_v6 = vadd.f32 0.09678418, %v1763_v56  ;;  %v1734_v18 = vmul.f32 %v3332_v26, %v1726_v39 }
 0x44b   : > { %v1807_v47 = vmul.f32 %v3273_v60, %v1799_v30  ;;  %v1786_v49 = vadd.f32 0.37409195, %v1778_v31  ;;  %v1757_v7 = vadd.f32 -0.18628806, %v1749_v61  ;;  %v1772_v19 = vadd.f32 0.09678418, %v1764_v5 }
 0x44c   : > { %v1808_v0 = vmul.f32 %v3278_v63, %v1800_v38  ;;  %v1793_v53 = vmul.f32 %v3288_v14, %v1785_v42  ;;  %v1779_v27 = vmul.f32 %v3305_v58, %v1771_v6  ;;  %v1742_v37 = vadd.f32 0.27886808, %v1734_v18 }
 0x44d   : > { %v1815_v3 = vadd.f32 %v3302_v50, %v1807_v47  ;;  %v1794_v41 = vmul.f32 %v3291_v17, %v1786_v49  ;;  %v1765_v30 = vmul.f32 %v3320_v12, %v1757_v7  ;;  %v1780_v50 = vmul.f32 %v3309_v1, %v1772_v19 }
 0x44e   : > { %v1816_v11 = vadd.f32 %v3307_v28, %v1808_v0  ;;  %v1801_v15 = vadd.f32 1.0000237, %v1793_v53  ;;  %v1787_v28 = vadd.f32 0.37409195, %v1779_v27  ;;  %v1750_v47 = vmul.f32 %v3332_v26, %v1742_v37 }
 0x44f   : > { %v1823_v16 = vmul.f32 1.442695, %v1815_v3  ;;  %v1802_v22 = vadd.f32 1.0000237, %v1794_v41  ;;  %v1773_v42 = vadd.f32 0.09678418, %v1765_v30  ;;  %v1668_v5 = vmul.f32 %v1660_v40, %v3261_v54 }
 0x450   : > { %v1825_v31 = vmul.f32 1.442695, %v1816_v11  ;;  %v1809_v35 = vmul.f32 %v3288_v14, %v1801_v15  ;;  %v1788_v46 = vadd.f32 0.37409195, %v1780_v50  ;;  %v1795_v56 = vmul.f32 %v3305_v58, %v1787_v28 }
 0x451   : > { %2690 = vpow2.f32 %v1823_v16  ;;  %v1810_v38 = vmul.f32 %v3291_v17, %v1802_v22  ;;  %v1661_v61 = vsub.f32 0.0, %v3271_v59  ;;  %v1781_v0 = vmul.f32 %v3320_v12, %v1773_v42 }
 0x452   : > { %2692 = vpow2.f32 %v1825_v31  ;;  %v1817_v43 = vadd.f32 %v3312_v2, %v1809_v35  ;;  %v1796_v39 = vmul.f32 %v3309_v1, %v1788_v46  ;;  %v1758_v3 = vadd.f32 -0.18628806, %v1750_v47 }
 0x453   : > { %v1818_v49 = vadd.f32 %v3317_v10, %v1810_v38  ;;  %v1803_v41 = vadd.f32 1.0000237, %v1795_v56  ;;  %v1789_v6 = vadd.f32 0.37409195, %v1781_v0  ;;  %v2348_v10 = vadd.f32 -1.2655122, %v3343_v33 }
 0x454   : > { %v1827_v53 = vmul.f32 1.442695, %v1817_v43  ;;  %v1804_v7 = vadd.f32 1.0000237, %v1796_v39  ;;  %v1766_v11 = vmul.f32 %v3332_v26, %v1758_v3  ;;  %v1669_v19 = vmul.f32 %v1661_v61, %v3271_v59 }
 0x455   : > { %v1829_v2 = vmul.f32 1.442695, %v1818_v49  ;;  %v1811_v15 = vmul.f32 %v3305_v58, %v1803_v41  ;;  %v1797_v18 = vmul.f32 %v3320_v12, %v1789_v6  ;;  %v2349_v54 = vadd.f32 -1.2655122, %v1668_v5 }
 0x456   : > { %2694 = vpow2.f32 %v1827_v53  ;;  %v1812_v40 = vmul.f32 %v3309_v1, %v1804_v7  ;;  %v1774_v16 = vadd.f32 0.09678418, %v1766_v11  ;;  %v1662_v30 = vsub.f32 0.0, %v3286_v13 }
 0x457   : > { %2696 = vpow2.f32 %v1829_v2  ;;  %v1819_v22 = vadd.f32 %v2348_v10, %v1811_v15  ;;  %v1805_v27 = vadd.f32 1.0000237, %v1797_v18  ;;  %v2350_v37 = vadd.f32 -1.2655122, %v1669_v19 }
 0x458   : > { %v1820_v31 = vadd.f32 %v2349_v54, %v1812_v40  ;;  %v1782_v33 = vmul.f32 %v3332_v26, %v1774_v16  ;;  %v1599_v59 = vmul.f32 0.5, %v3215_v20  ;;  %v1670_v49 = vmul.f32 %v1662_v30, %v3286_v13 }
 0x459   : > { %v1831_v50 = vmul.f32 1.442695, %v1819_v22  ;;  %v1813_v38 = vmul.f32 %v3320_v12, %v1805_v27  ;;  %v1600_v2 = vmul.f32 0.5, %v3217_v8 }
 0x45a   : > { %v1833_v43 = vmul.f32 1.442695, %v1820_v31  ;;  %v1790_v46 = vadd.f32 0.37409195, %v1782_v33  ;;  %v2351_v7 = vadd.f32 -1.2655122, %v1670_v49 }
 0x45b   : > { %v2691_v35 = vpop.eup %2690  ;;  %2698 = vpow2.f32 %v1831_v50  ;;  %v1821_v47 = vadd.f32 %v2350_v37, %v1813_v38 }
 0x45c   : > { %v2693_v28 = vpop.eup %2692  ;;  %v1839_v42 = vmul.f32 %v2691_v35, %v3273_v60  ;;  %2700 = vpow2.f32 %v1833_v43  ;;  %v1798_v53 = vmul.f32 %v3332_v26, %v1790_v46 }
 0x45d   : > { %v1840_v56 = vmul.f32 %v2693_v28, %v3278_v63  ;;  %v1835_v5 = vmul.f32 1.442695, %v1821_v47  ;;  %v1603_v47 = vmul.f32 0.5, %v3245_v44 }
 0x45e   : > { %v1855_v61 = vsub.f32 1.0, %v1839_v42  ;;  %v2352_v0 = vadd.f32 -1.0, %v1839_v42  ;;  %v1806_v41 = vadd.f32 1.0000237, %v1798_v53 }
 0x45f   : > { %v1856_v39 = vsub.f32 1.0, %v1840_v56  ;;  %v2353_v20 = vadd.f32 -1.0, %v1840_v56  ;;  %2702 = vpow2.f32 %v1835_v5 }
 0x460   : > { %v2695_v3 = vpop.eup %2694  ;;  %v1871_v60 = vsel %vm1847_vm3, %v1855_v61, %v2352_v0  ;;  %v1814_v11 = vmul.f32 %v3332_v26, %v1806_v41 }
 0x461   : > { %v2697_v13 = vpop.eup %2696  ;;  %v1879_v6 = vadd.f32 1.0, %v1871_v60  ;;  %v1872_v63 = vsel %vm1848_vm4, %v1856_v39, %v2353_v20  ;;  %v1841_v10 = vmul.f32 %v2695_v3, %v3288_v14  ;;  %v1601_v14 = vmul.f32 0.5, %v3231_v29 }
 0x462   : > { %v1880_v23 = vadd.f32 1.0, %v1872_v63  ;;  %v1842_v15 = vmul.f32 %v2697_v13, %v3291_v17  ;;  %v1822_v54 = vadd.f32 %v2351_v7, %v1814_v11  ;;  %v1602_v17 = vmul.f32 0.5, %v3234_v32  ;;  %v2360_v13 = vld [vmem:[%s672_s22] ss:$0 sm:$0xff]  ;;  %s2714_s22 = scalar_lea.vmem %s3466_s26, 512 }
 0x463   : > { %v1887_v19 = vmul.f32 %v1879_v6, %v1599_v59  ;;  %v1857_v18 = vsub.f32 1.0, %v1841_v10  ;;  %v2354_v8 = vadd.f32 -1.0, %v1841_v10  ;;  %p2715_p1 = scmp.ne.s32.totalorder %s3466_s26, %s2714_s22 }
 0x464   : > { %v1888_v25 = vmul.f32 %v1880_v23, %v1600_v2  ;;  %v1858_v40 = vsub.f32 1.0, %v1842_v15  ;;  %v2355_v16 = vadd.f32 -1.0, %v1842_v15  ;;  %v1837_v27 = vmul.f32 1.442695, %v1822_v54 }
 0x465   : > { %v1873_v22 = vsel %vm1849_vm5, %v1857_v18, %v2354_v8  ;;  %v2699_v33 = vpop.eup %2698  ;;  %p2716_p2 = pnand %p2715_p1, %p2945_p3 }
 0x466   : > { %1998 = vmatprep.mubr.f32.mxu1 %v1888_v25  ;;  %v1874_v30 = vsel %vm1850_vm6, %v1858_v40, %v2355_v16  ;;  %v1881_v31 = vadd.f32 1.0, %v1873_v22  ;;  %v2701_v35 = vpop.eup %2700  ;;  %2704 = vpow2.f32 %v1837_v27  ;;  %v1843_v37 = vmul.f32 %v2699_v33, %v3305_v58 }
 0x467   : > { %1999 = vmatmul.mubr.f32.vlgmr.msra.gmra.mrb[2].mxu1 %v1887_v19  ;;  %v1882_v34 = vadd.f32 1.0, %v1874_v30  ;;  %v1844_v36 = vmul.f32 %v2701_v35, %v3309_v1  ;;  %v1604_v1 = vmul.f32 0.5, %v3247_v45  ;;  %p2717_p4 = pneg %p2716_p2 }
 0x468   : > { %v1889_v50 = vmul.f32 %v1881_v31, %v1601_v14  ;;  %v1859_v28 = vsub.f32 1.0, %v1843_v37  ;;  %v2356_v59 = vadd.f32 -1.0, %v1843_v37 }
 0x469   : > { %v1890_v38 = vmul.f32 %v1882_v34, %v1602_v17  ;;  %v2703_v29 = vpop.eup %2702  ;;  %v1860_v42 = vsub.f32 1.0, %v1844_v36  ;;  %v2357_v43 = vadd.f32 -1.0, %v1844_v36 }
 0x46a   : > { %v1875_v32 = vsel %vm1851_vm7, %v1859_v28, %v2356_v59  ;;  %v1845_v46 = vmul.f32 %v2703_v29, %v3320_v12 }
 0x46b   : > { %2003 = vmatprep.mubr.f32.mxu1 %v1890_v38  ;;  %v1876_v58 = vsel %vm1852_vm8, %v1860_v42, %v2357_v43  ;;  %v1883_v49 = vadd.f32 1.0, %v1875_v32 }
 0x46c   : > { %2004 = vmatmul.mubr.f32.gmra.mrb[4].mxu1 %v1889_v50  ;;  %v1884_v56 = vadd.f32 1.0, %v1876_v58  ;;  %v1861_v61 = vsub.f32 1.0, %v1845_v46  ;;  %v2358_v0 = vadd.f32 -1.0, %v1845_v46 }
 0x46d   : > { %v1891_v51 = vmul.f32 %v1883_v49, %v1603_v47 }
 0x46e   : > { %v1892_v53 = vmul.f32 %v1884_v56, %v1604_v1  ;;  %v1877_v5 = vsel %vm1853_vm9, %v1861_v61, %v2358_v0 }
 0x46f   : > { %v1885_v39 = vadd.f32 1.0, %v1877_v5 }
 0x470   : > { %v2705_v20 = vpop.eup %2704  ;;  %2008 = vmatprep.mubr.f32.mxu1 %v1892_v53 }
 0x471   : > { %2009 = vmatmul.mubr.f32.gmra.mrb[6].mxu1 %v1891_v51  ;;  %v1846_v44 = vmul.f32 %v2705_v20, %v3332_v26  ;;  %v1893_v12 = vmul.f32 %v1885_v39, %v1605_v52  ;;  %v2361_v39 = vld [vmem:[%s675_s0] ss:$0 sm:$0xff]  ;;  %s2375_s0 = sshll.u32 %s3592_s20, 2  ;;  %s2720_s20 = scalar_lea.vmem %s2719_s6, 1024 }
 0x472   : > { %p2722_p6 = scmp.lt.s32.totalorder %s2720_s20, %s2714_s22 }
 0x473   : > { %v1862_v3 = vsub.f32 1.0, %v1846_v44  ;;  %v2359_v45 = vadd.f32 -1.0, %v1846_v44 }
 0x474   : > { %p2723_p7 = por %p2722_p6, %p2721_p5 }
 0x475   : > { %v1878_v60 = vsel %vm1854_vm10, %v1862_v3, %v2359_v45 }
 0x476   : > { %v1886_v2 = vadd.f32 1.0, %v1878_v60  ;;  %p2724_p9 = pnand %p2723_p7, %p2717_p4 }
 0x478   : > { %v1894_v41 = vmul.f32 %v1886_v2, %v1606_v55 }
 0x47a   : > { %2013 = vmatprep.mubr.f32.mxu1 %v1894_v41 }
 0x47b   : > { %2014 = vmatmul.mubr.f32.gmra.mrb[8].mxu1 %v1893_v12  ;;  %v2362_v12 = vld [vmem:[%s678_s5] ss:$0 sm:$0xff]  ;;  %s2366_s5 = sshll.u32 %s2792_s21, 3  ;;  %s3597_s21 = sand.u32 1, %s3593_s29  }
 0x47c   : > { %s2119_s24 = sadd.s32 %s2375_s0, %s2366_s5  ;;  %s3473_s23 = scalar_lea.sflag [#allocation4], %s3597_s21 }
 0x47d   : > { %s2367_s18 = sshll.u32 %s2119_s24, 7 }
 0x47e   : > { %s3464_s25 = scalar_lea.hbm %s3595_s19, %s2367_s18 }
 0x53a   : > { %v2440_v48 = vpop.f32.mrb[2].mxu1 }
 0x53b   : > { %v2441_v6 = vpop.f32.mrb[3].mxu1 }
 0x53c   : > { %v2442_v26 = vadd.f32 %v2441_v6, %v2440_v48 }
 0x53e   : > { %v2001_v63 = vadd.f32 %v2442_v26, %v2360_v13 }
 0x53f   : > { %v2443_v10 = vpop.f32.mrb[4].mxu1 }
 0x540   : > { %v2444_v7 = vpop.f32.mrb[5].mxu1  ;;  %v2019_v62 = vadd.f32 %v2001_v63, %v3163_v4 }
 0x541   : > { %v2445_v11 = vadd.f32 %v2444_v7, %v2443_v10 }
 0x542   : > { %v2025_v57 = vsel %vm1396_vm2, %v2019_v62, 0.0 }
 0x543   : > { %v2006_v23 = vadd.f32 %v2445_v11, %v2360_v13  ;;  %2026 = vadd.xlane.f32.xlu0 %v2025_v57 }
 0x544   : > { %v2446_v19 = vpop.f32.mrb[6].mxu1 }
 0x545   : > { %v2020_v15 = vadd.f32 %v2006_v23, %v3169_v21  ;;  %v2447_v18 = vpop.f32.mrb[7].mxu1 }
 0x546   : > { %v2448_v54 = vadd.f32 %v2447_v18, %v2446_v19 }
 0x547   : > { %v2028_v8 = vsel %vm1396_vm2, %v2020_v15, 0.0 }
 0x548   : > { %2029 = vadd.xlane.f32.xlu1 %v2028_v8  ;;  %v2011_v25 = vadd.f32 %v2448_v54, %v2360_v13 }
 0x54a   : > { %v2021_v40 = vadd.f32 %v2011_v25, %v3174_v9 }
 0x54c   : > { %v2031_v16 = vsel %vm1396_vm2, %v2021_v40, 0.0 }
 0x54d   : > { %2032 = vadd.xlane.f32.xlu0 %v2031_v16 }
 0x54e   : > { %v2449_v4 = vpop.f32.mrb[8].mxu1 }
 0x54f   : > { %v2450_v22 = vpop.f32.mrb[9].mxu1 }
 0x550   : > { %v2451_v14 = vadd.f32 %v2450_v22, %v2449_v4 }
 0x552   : > { %v2016_v27 = vadd.f32 %v2451_v14, %v2360_v13 }
 0x554   : > { %v2022_v30 = vadd.f32 %v2016_v27, %v3178_v24 }
 0x556   : > { %v2034_v21 = vsel %vm1396_vm2, %v2022_v30, 0.0 }
 0x557   : > { %2035 = vadd.xlane.f32.xlu1 %v2034_v21 }
 0x5d0   : > { %v2027_v31 = vpop.xlane.xlu0 %2026 }
 0x5d1   : > { %v2037_v33 = vmul.f32 0.015625, %v2027_v31 }
 0x5d3   : > { %v2041_v17 = vsub.f32 %v2019_v62, %v2037_v33 }
 0x5d5   : > { %v2030_v34 = vpop.xlane.xlu1 %2029  ;;  %v2045_v35 = vmul.f32 %v2041_v17, %v2041_v17 }
 0x5d6   : > { %v2038_v50 = vmul.f32 0.015625, %v2030_v34 }
 0x5d7   : > { %v2049_v9 = vsel %vm1396_vm2, %v2045_v35, 0.0 }
 0x5d8   : > { %v2042_v37 = vsub.f32 %v2020_v15, %v2038_v50  ;;  %2050 = vadd.xlane.f32.xlu0 %v2049_v9 }
 0x5da   : > { %v2046_v38 = vmul.f32 %v2042_v37, %v2042_v37  ;;  %v2033_v36 = vpop.xlane.xlu0 %2032 }
 0x5db   : > { %v2039_v59 = vmul.f32 0.015625, %v2033_v36 }
 0x5dc   : > { %v2052_v28 = vsel %vm1396_vm2, %v2046_v38, 0.0 }
 0x5dd   : > { %2053 = vadd.xlane.f32.xlu1 %v2052_v28  ;;  %v2043_v24 = vsub.f32 %v2021_v40, %v2039_v59 }
 0x5df   : > { %v2047_v29 = vmul.f32 %v2043_v24, %v2043_v24 }
 0x5e1   : > { %v2055_v42 = vsel %vm1396_vm2, %v2047_v29, 0.0 }
 0x5e2   : > { %2056 = vadd.xlane.f32.xlu0 %v2055_v42 }
 0x5e4   : > { %v2036_v43 = vpop.xlane.xlu1 %2035 }
 0x5e5   : > { %v2040_v32 = vmul.f32 0.015625, %v2036_v43 }
 0x5e7   : > { %v2044_v46 = vsub.f32 %v2022_v30, %v2040_v32 }
 0x5e9   : > { %v2048_v47 = vmul.f32 %v2044_v46, %v2044_v46 }
 0x5eb   : > { %v2058_v58 = vsel %vm1396_vm2, %v2048_v47, 0.0 }
 0x5ec   : > { %2059 = vadd.xlane.f32.xlu1 %v2058_v58 }
 0x665   : > { %v2051_v49 = vpop.xlane.xlu0 %2050 }
 0x666   : > { %v2061_v1 = vmul.f32 0.015625, %v2051_v49 }
 0x668   : > { %v2065_v56 = vadd.f32 1e-12, %v2061_v1 }
 0x66a   : > { %2706 = vrsqrt.f32 %v2065_v56  ;;  %v2054_v61 = vpop.xlane.xlu1 %2053 }
 0x66b   : > { %v2062_v0 = vmul.f32 0.015625, %v2054_v61 }
 0x66d   : > { %v2066_v51 = vadd.f32 1e-12, %v2062_v0 }
 0x66f   : > { %2708 = vrsqrt.f32 %v2066_v51  ;;  %v2057_v53 = vpop.xlane.xlu0 %2056 }
 0x670   : > { %v2063_v5 = vmul.f32 0.015625, %v2057_v53 }
 0x672   : > { %v2067_v20 = vadd.f32 1e-12, %v2063_v5 }
 0x674   : > { %v2707_v52 = vpop.eup %2706  ;;  %2710 = vrsqrt.f32 %v2067_v20 }
 0x675   : > { %v2073_v44 = vmul.f32 %v2707_v52, %v2041_v17 }
 0x677   : > { %v2083_v3 = vmul.f32 %v2361_v39, %v2073_v44 }
 0x679   : > { %v2709_v45 = vpop.eup %2708  ;;  %v2093_v60 = vadd.f32 %v2362_v12, %v2083_v3  ;;  %v2060_v2 = vpop.xlane.xlu1 %2059 }
 0x67a   : > { %v2074_v55 = vmul.f32 %v2709_v45, %v2042_v37  ;;  %v2064_v48 = vmul.f32 0.015625, %v2060_v2 }
 0x67b   : > { %2097 = vst.msk [vmem:[#allocation2] sm:$0xff] %vm1396_vm2, %v2093_v60  ;;  %2101 = vst.msk [vmem:[%s3025_s30] sm:$0xff] %vm1396_vm2, %v2093_v60 }
 0x67c   : > { %v2084_v41 = vmul.f32 %v2361_v39, %v2074_v55  ;;  %v2068_v6 = vadd.f32 1e-12, %v2064_v48 }
 0x67e   : > { %v2094_v13 = vadd.f32 %v2362_v12, %v2084_v41  ;;  %v2711_v26 = vpop.eup %2710  ;;  %2712 = vrsqrt.f32 %v2068_v6 }
 0x67f   : > { %v2075_v63 = vmul.f32 %v2711_v26, %v2043_v24 }
 0x680   : > { %2098 = vst.msk [vmem:[#allocation2 + $0x8] sm:$0xff] %vm1396_vm2, %v2094_v13  ;;  %2102 = vst.msk [vmem:[%s3025_s30 + $0x8] sm:$0xff] %vm1396_vm2, %v2094_v13 }
 0x681   : > { %v2085_v10 = vmul.f32 %v2361_v39, %v2075_v63 }
 0x683   : > { %v2095_v7 = vadd.f32 %v2362_v12, %v2085_v10 }
 0x685   : > { %2099 = vst.msk [vmem:[#allocation2 + $0x10] sm:$0xff] %vm1396_vm2, %v2095_v7  ;;  %2103 = vst.msk [vmem:[%s3025_s30 + $0x10] sm:$0xff] %vm1396_vm2, %v2095_v7 }
 0x688   : > { %v2713_v62 = vpop.eup %2712 }
 0x689   : > { %v2076_v11 = vmul.f32 %v2713_v62, %v2044_v46 }
 0x68b   : > { %v2086_v57 = vmul.f32 %v2361_v39, %v2076_v11 }
 0x68d   : > { %v2096_v23 = vadd.f32 %v2362_v12, %v2086_v57 }
 0x68f   : > { %2100 = vst.msk [vmem:[#allocation2 + $0x18] sm:$0xff] %vm1396_vm2, %v2096_v23  ;;  %2104 = vst.msk [vmem:[%s3025_s30 + $0x18] sm:$0xff] %vm1396_vm2, %v2096_v23 }
 0x690   : > { %2727 = shalt.err (!%p2724_p9)
}
 0x691   : > { %s2728_s30 = scalar_lea.hbm %s3464_s25, 512  ;;  %s2732_s5 = scalar_lea.hbm %s3596_s2, 2048 }
 0x692   : > { %p2729_p10 = scmp.ne.s32.totalorder %s3464_s25, %s2728_s30  ;;  %p2733_p13 = scmp.lt.u32.totalorder %s3464_s25, %s3596_s2 }
 0x693   : > { %p2734_p0 = scmp.lt.u32.totalorder %s2732_s5, %s2728_s30  ;;  %p2736_p2 = scmp.lt.u32.totalorder %s2728_s30, %s3464_s25 }
 0x694   : > { %p2730_p11 = pnand %p2729_p10, %p2945_p3 }
 0x695   : > { %p2735_p1 = por %p2734_p0, %p2733_p13 }
 0x696   : > { %p2731_p12 = pneg %p2730_p11 }
 0x697   : > { %p2737_p4 = por %p2736_p2, %p2735_p1 }
 0x699   : > { %p2738_p5 = pnand %p2737_p4, %p2731_p12 }
 0x69b   : > { %2741 = shalt.err (!%p2738_p5)
}
 0x69c   : > { %s2812_s17 = smov 128   ;;  %s2813_s27 = smov 8  }
 0x69d   : > { %2592 = dma.vmem_to_hbm [thread:$0]  (%p2945_p3), %s3466_s26, 512, %s3464_s25, %s3473_s23, %s2812_s17, %s2812_s17, %s2813_s27  }
 0x69e PF: > { %s3598_s19 = sld [smem:[#allocation12_spill]]  ;;  %s3599_s21 = sld [smem:[#allocation6_spill]] }
 0x6a4   : > { %p2598_p6 = scmp.ge.s32.totalorder %s3598_s19, 2  ;;  %s2137_s3 = sand.u32 1, %s3599_s21  }
 0x6a5   : > { %s2138_s6 = scalar_lea.sflag [#allocation4], %s2137_s3 }
 0x6a6   : > { %p2595_p7 = pnand %p2598_p6, %p2954_p8 }
 0x6a8   : > { %2775 = dma.done.wait (!%p2595_p7), %s2138_s6, 512  }
 0x6a9   : > { %2777 = vsyncadd (!%p2595_p7), %s2138_s6, 4294966784  ;;  %s28_s25 = sadd.s32 1, %s3598_s19   ;;  %s3601_s18 = sld [smem:[#allocation7_spill]] }
 0x6aa   : > { %p25_p9 = scmp.ge.s32.totalorder %s28_s25, 6   ;;  %s3602_s19 = sld [smem:[#allocation8_spill]] }
 0x6ab   : > { %s3603_s20 = sld [smem:[#allocation17_spill]]  ;;  %s3604_s21 = sld [smem:[#allocation10_spill]] }
 0x6ac   : > { %s3605_s22 = sld [smem:[#allocation11_spill]]  ;;  %s3606_s23 = sld [smem:[#allocation13_spill]] }
 0x6ad   : > { %s3607_s24 = sld [smem:[#allocation15_spill]]  ;;  %27 = sbr.rel (!%p25_p9) target bundleno = 14 (0xe), region = 149 }
 0x6b4   :  { %2143 = vsyncpa [#allocation4], 1 }
 0x6b5   :  { %2145 = vsyncpa [#allocation4 + $0x1], 1 }

</bundles_post_ra>
